<compile_context>
chip_gen: v6e
topology: v6e:2x2x1
jax: 0.10.0
libtpu: 0.0.40
codegen_flags: <defaults>
</compile_context>

<pallas_src>
import math
from functools import partial

import jax
import jax.numpy as jnp
from jax import lax
from jax.experimental import pallas as pl
from jax.experimental.pallas import tpu as pltpu


# ----------------------------------------------------------------------------
# Fused Pallas kernel: projections + attention + output projection, per batch.
# ----------------------------------------------------------------------------
def mha_fused_kernel(*refs, h, dk, has_mask):
    if has_mask:
        (q_ref, k_ref, v_ref,
         wq_ref, wk_ref, wv_ref, wo_ref,
         bq_ref, bk_ref, bv_ref, bo_ref,
         mask_ref,
         o_ref,
         q_scr, k_scr, v_scr, ctx_scr) = refs
    else:
        (q_ref, k_ref, v_ref,
         wq_ref, wk_ref, wv_ref, wo_ref,
         bq_ref, bk_ref, bv_ref, bo_ref,
         o_ref,
         q_scr, k_scr, v_scr, ctx_scr) = refs
        mask_ref = None

    bf16 = jnp.bfloat16

    # ---- Input projections: (S, D) @ (D, D), bf16 operands, f32 MXU accum.
    # The 1/sqrt(d_k) scale is pre-folded into wq / bq (prepare_params).
    q = jnp.dot(q_ref[...].astype(bf16), wq_ref[...],
                preferred_element_type=jnp.float32) + bq_ref[...]
    k = jnp.dot(k_ref[...].astype(bf16), wk_ref[...],
                preferred_element_type=jnp.float32) + bk_ref[...]
    v = jnp.dot(v_ref[...].astype(bf16), wv_ref[...],
                preferred_element_type=jnp.float32) + bv_ref[...]

    # Scatter heads into head-major (h, S, dk) scratch using static,
    # lane-aligned slices; the attention loop then only indexes the leading
    # (head) axis dynamically.
    q = q.astype(bf16)
    k = k.astype(bf16)
    v = v.astype(bf16)
    for j in range(h):
        lo = j * dk
        q_scr[j] = q[:, lo:lo + dk]
        k_scr[j] = k[:, lo:lo + dk]
        v_scr[j] = v[:, lo:lo + dk]

    mask = mask_ref[...] if has_mask else None   # loaded once, loop-invariant

    # ---- Per-head attention. fori_loop bounds live ranges: only one head's
    # (S, S) score / probability matrices exist at a time.
    def head_body(i, carry):
        qh = q_scr[i]                                   # (S, dk) bf16
        kh = k_scr[i]
        vh = v_scr[i]

        s = jnp.dot(qh, kh.T, preferred_element_type=jnp.float32)   # (S, S)
        if mask is not None:
            s = s + mask

        m = jnp.max(s, axis=-1, keepdims=True)
        p = jnp.exp(s - m)                               # unnormalized probs
        l = jnp.sum(p, axis=-1, keepdims=True)

        ctx = jnp.dot(p.astype(bf16), vh,
                      preferred_element_type=jnp.float32)           # (S, dk)
        # Deferred softmax normalization on (S, dk); reciprocal runs on EUP.
        ctx = ctx * pl.reciprocal(l, approx=True)
        ctx_scr[i] = ctx.astype(bf16)
        return carry

    lax.fori_loop(0, h, head_body, 0)

    # ---- Head merge + output projection as ONE full-K (S, D) @ (D, D) matmul.
    ctx_all = jnp.concatenate([ctx_scr[j] for j in range(h)], axis=-1)  # (S, D)
    out = jnp.dot(ctx_all, wo_ref[...],
                  preferred_element_type=jnp.float32) + bo_ref[...]
    o_ref[...] = out.astype(o_ref.dtype)


# ----------------------------------------------------------------------------
# One-time parameter transform (scale fold + bf16 weights)
# ----------------------------------------------------------------------------
def prepare_params(params):
    h = params["h"]
    D = params["wq"].shape[0]
    dk = D // h
    scale = 1.0 / math.sqrt(dk)
    f32 = jnp.float32
    return {
        "h": h,
        "dk": dk,
        "wq": (params["wq"].astype(f32) * scale).astype(jnp.bfloat16),
        "wk": params["wk"].astype(jnp.bfloat16),
        "wv": params["wv"].astype(jnp.bfloat16),
        "wo": params["wo"].astype(jnp.bfloat16),
        "bq": (params["bq"].astype(f32) * scale).reshape(1, D),
        "bk": params["bk"].astype(f32).reshape(1, D),
        "bv": params["bv"].astype(f32).reshape(1, D),
        "bo": params["bo"].astype(f32).reshape(1, D),
    }


# ----------------------------------------------------------------------------
# Wrapper
# ----------------------------------------------------------------------------
def multi_headed_attention(kparams, Q, K, V, mask=None):
    """Q, K, V: (B, S, d_model) -> (B, S, d_model). kparams = prepare_params(...)."""
    B, S, D = Q.shape
    h = kparams["h"]
    dk = kparams["dk"]

    act_spec = pl.BlockSpec((None, S, D), lambda b: (b, 0, 0))   # squeezed batch
    w_spec = pl.BlockSpec((D, D), lambda b: (0, 0))
    bias_spec = pl.BlockSpec((1, D), lambda b: (0, 0))

    args = [Q, K, V,
            kparams["wq"], kparams["wk"], kparams["wv"], kparams["wo"],
            kparams["bq"], kparams["bk"], kparams["bv"], kparams["bo"]]
    in_specs = [act_spec, act_spec, act_spec,
                w_spec, w_spec, w_spec, w_spec,
                bias_spec, bias_spec, bias_spec, bias_spec]

    has_mask = mask is not None
    if has_mask:
        m = jnp.asarray(mask, jnp.float32)
        # Only broadcastable masks (leading dims of size 1): pass at natural
        # (S, S) shape, no (B, h, S, S) materialization.
        assert all(d == 1 for d in m.shape[:-2]), \
            "per-batch / per-head masks not supported"   # TODO(synk)
        args.append(m.reshape(S, S))
        in_specs.append(pl.BlockSpec((S, S), lambda b: (0, 0)))

    return pl.pallas_call(
        partial(mha_fused_kernel, h=h, dk=dk, has_mask=has_mask),
        out_shape=jax.ShapeDtypeStruct((B, S, D), Q.dtype),
        grid=(B,),
        in_specs=in_specs,
        out_specs=pl.BlockSpec((None, S, D), lambda b: (b, 0, 0)),
        scratch_shapes=[
            pltpu.VMEM((h, S, dk), jnp.bfloat16),   # q heads
            pltpu.VMEM((h, S, dk), jnp.bfloat16),   # k heads
            pltpu.VMEM((h, S, dk), jnp.bfloat16),   # v heads
            pltpu.VMEM((h, S, dk), jnp.bfloat16),   # ctx heads
        ],
        compiler_params=pltpu.CompilerParams(
            dimension_semantics=("parallel",),
            vmem_limit_bytes=32 * 1024 * 1024),
    )(*args)


# ----------------------------------------------------------------------------
# Pure-JAX reference (mirrors the PyTorch forward exactly, f32)
# ----------------------------------------------------------------------------
def reference(params, Q, K, V, mask=None):
    B, S, D = Q.shape
    h = params["h"]
    dk = D // h

    def lin(x, w, b):
        return x @ w + b

    q = lin(Q, params["wq"], params["bq"]).reshape(B, S, h, dk).transpose(0, 2, 1, 3)
    k = lin(K, params["wk"], params["bk"]).reshape(B, S, h, dk).transpose(0, 2, 1, 3)
    v = lin(V, params["wv"], params["bv"]).reshape(B, S, h, dk).transpose(0, 2, 1, 3)
    s = jnp.einsum("bhqd,bhkd->bhqk", q, k) / math.sqrt(dk)
    if mask is not None:
        s = s + mask
    p = jax.nn.softmax(s, axis=-1)
    x = jnp.einsum("bhqk,bhkd->bhqd", p, v)
    x = x.transpose(0, 2, 1, 3).reshape(B, S, h * dk)
    return lin(x, params["wo"], params["bo"])


# ----------------------------------------------------------------------------
# Main
# ----------------------------------------------------------------------------
if __name__ == "__main__":
    # Small shapes, but with d_k = 128 so head slices are lane-tile aligned.
    B, S, d_model, h = 2, 128, 256, 2

    key = jax.random.PRNGKey(0)
    keys = jax.random.split(key, 11)

    def w_init(k):
        return jax.random.normal(k, (d_model, d_model), jnp.float32) / math.sqrt(d_model)

    def b_init(k):
        return jax.random.normal(k, (d_model,), jnp.float32) * 0.02

    params = {
        "h": h,
        "wq": w_init(keys[0]), "bq": b_init(keys[1]),
        "wk": w_init(keys[2]), "bk": b_init(keys[3]),
        "wv": w_init(keys[4]), "bv": b_init(keys[5]),
        "wo": w_init(keys[6]), "bo": b_init(keys[7]),
    }
    kparams = prepare_params(params)

    Q = jax.random.normal(keys[8], (B, S, d_model), jnp.float32)
    K = jax.random.normal(keys[9], (B, S, d_model), jnp.float32)
    V = jax.random.normal(keys[10], (B, S, d_model), jnp.float32)

    # --- no mask ---
    out = jax.block_until_ready(multi_headed_attention(kparams, Q, K, V))
    ref = reference(params, Q, K, V)
    assert out.shape == (B, S, d_model)
    # bf16 matmul operands (f32 accumulation) -> looser tolerance vs f32 ref.
    assert jnp.allclose(out, ref, atol=5e-2, rtol=5e-2), "mismatch vs reference (no mask)"

    # --- additive causal mask, PyTorch-style broadcast shape (1, 1, S, S) ---
    causal = jnp.where(jnp.tril(jnp.ones((S, S), dtype=bool)), 0.0, -1e9).astype(jnp.float32)
    mask = causal[None, None, :, :]
    out_m = jax.block_until_ready(multi_headed_attention(kparams, Q, K, V, mask=mask))
    ref_m = reference(params, Q, K, V, mask=mask)
    assert jnp.allclose(out_m, ref_m, atol=5e-2, rtol=5e-2), "mismatch vs reference (mask)"

    print("KERNEL_OK")
</pallas_src>

<mosaic_0001>
module attributes {stable_mosaic.version = 11 : i64} {
  func.func @mha_fused_kernel(%arg0: i32, %arg1: memref<1x128x256xf32, #tpu.memory_space<vmem>>, %arg2: memref<1x128x256xf32, #tpu.memory_space<vmem>>, %arg3: memref<1x128x256xf32, #tpu.memory_space<vmem>>, %arg4: memref<256x256xbf16, #tpu.memory_space<vmem>>, %arg5: memref<256x256xbf16, #tpu.memory_space<vmem>>, %arg6: memref<256x256xbf16, #tpu.memory_space<vmem>>, %arg7: memref<256x256xbf16, #tpu.memory_space<vmem>>, %arg8: memref<1x256xf32, #tpu.memory_space<vmem>>, %arg9: memref<1x256xf32, #tpu.memory_space<vmem>>, %arg10: memref<1x256xf32, #tpu.memory_space<vmem>>, %arg11: memref<1x256xf32, #tpu.memory_space<vmem>>, %arg12: memref<1x128x256xf32, #tpu.memory_space<vmem>>, %arg13: memref<2x128x128xbf16, #tpu.memory_space<vmem>>, %arg14: memref<2x128x128xbf16, #tpu.memory_space<vmem>>, %arg15: memref<2x128x128xbf16, #tpu.memory_space<vmem>>, %arg16: memref<2x128x128xbf16, #tpu.memory_space<vmem>>) attributes {dimension_semantics = [#tpu.dimension_semantics<parallel>], iteration_bounds = array<i64: 2>, scalar_prefetch = 0 : i64, scratch_operands = 4 : i64, tpu.core_type = #tpu.core_type<tc>, window_params = [{transform_indices = @transform_0, window_bounds = array<i64: 1, 128, 256>}, {transform_indices = @transform_1, window_bounds = array<i64: 1, 128, 256>}, {transform_indices = @transform_2, window_bounds = array<i64: 1, 128, 256>}, {pipeline_mode = #tpu.pipeline_mode<synchronous>, transform_indices = @transform_3, window_bounds = array<i64: 256, 256>}, {pipeline_mode = #tpu.pipeline_mode<synchronous>, transform_indices = @transform_4, window_bounds = array<i64: 256, 256>}, {pipeline_mode = #tpu.pipeline_mode<synchronous>, transform_indices = @transform_5, window_bounds = array<i64: 256, 256>}, {pipeline_mode = #tpu.pipeline_mode<synchronous>, transform_indices = @transform_6, window_bounds = array<i64: 256, 256>}, {pipeline_mode = #tpu.pipeline_mode<synchronous>, transform_indices = @transform_7, window_bounds = array<i64: 1, 256>}, {pipeline_mode = #tpu.pipeline_mode<synchronous>, transform_indices = @transform_8, window_bounds = array<i64: 1, 256>}, {pipeline_mode = #tpu.pipeline_mode<synchronous>, transform_indices = @transform_9, window_bounds = array<i64: 1, 256>}, {pipeline_mode = #tpu.pipeline_mode<synchronous>, transform_indices = @transform_10, window_bounds = array<i64: 1, 256>}, {transform_indices = @transform_11, window_bounds = array<i64: 1, 128, 256>}]} {
    %c0 = arith.constant 0 : index
    %c0_0 = arith.constant 0 : index
    %c0_1 = arith.constant 0 : index
    %0 = vector.load %arg1[%c0, %c0_0, %c0_1] : memref<1x128x256xf32, #tpu.memory_space<vmem>>, vector<1x128x256xf32>
    %1 = vector.shape_cast %0 : vector<1x128x256xf32> to vector<128x256xf32>
    %2 = arith.truncf %1 : vector<128x256xf32> to vector<128x256xbf16>
    %c0_2 = arith.constant 0 : index
    %c0_3 = arith.constant 0 : index
    %3 = vector.load %arg4[%c0_2, %c0_3] : memref<256x256xbf16, #tpu.memory_space<vmem>>, vector<256x256xbf16>
    %cst = arith.constant dense<0.000000e+00> : vector<128x256xf32>
    %4 = tpu.matmul %2, %3, %cst {dimension_numbers = #tpu.dot_dimension_numbers<[1], [0], [0], [1], [0, 0, 1, 1], [], []>} : vector<128x256xbf16>, vector<256x256xbf16>, vector<128x256xf32> -> vector<128x256xf32>
    %c0_4 = arith.constant 0 : index
    %c0_5 = arith.constant 0 : index
    %5 = vector.load %arg8[%c0_4, %c0_5] : memref<1x256xf32, #tpu.memory_space<vmem>>, vector<1x256xf32>
    %6 = vector.broadcast %5 : vector<1x256xf32> to vector<128x256xf32>
    %7 = arith.addf %4, %6 : vector<128x256xf32>
    %c0_6 = arith.constant 0 : index
    %c0_7 = arith.constant 0 : index
    %c0_8 = arith.constant 0 : index
    %8 = vector.load %arg2[%c0_6, %c0_7, %c0_8] : memref<1x128x256xf32, #tpu.memory_space<vmem>>, vector<1x128x256xf32>
    %9 = vector.shape_cast %8 : vector<1x128x256xf32> to vector<128x256xf32>
    %10 = arith.truncf %9 : vector<128x256xf32> to vector<128x256xbf16>
    %c0_9 = arith.constant 0 : index
    %c0_10 = arith.constant 0 : index
    %11 = vector.load %arg5[%c0_9, %c0_10] : memref<256x256xbf16, #tpu.memory_space<vmem>>, vector<256x256xbf16>
    %cst_11 = arith.constant dense<0.000000e+00> : vector<128x256xf32>
    %12 = tpu.matmul %10, %11, %cst_11 {dimension_numbers = #tpu.dot_dimension_numbers<[1], [0], [0], [1], [0, 0, 1, 1], [], []>} : vector<128x256xbf16>, vector<256x256xbf16>, vector<128x256xf32> -> vector<128x256xf32>
    %c0_12 = arith.constant 0 : index
    %c0_13 = arith.constant 0 : index
    %13 = vector.load %arg9[%c0_12, %c0_13] : memref<1x256xf32, #tpu.memory_space<vmem>>, vector<1x256xf32>
    %14 = vector.broadcast %13 : vector<1x256xf32> to vector<128x256xf32>
    %15 = arith.addf %12, %14 : vector<128x256xf32>
    %c0_14 = arith.constant 0 : index
    %c0_15 = arith.constant 0 : index
    %c0_16 = arith.constant 0 : index
    %16 = vector.load %arg3[%c0_14, %c0_15, %c0_16] : memref<1x128x256xf32, #tpu.memory_space<vmem>>, vector<1x128x256xf32>
    %17 = vector.shape_cast %16 : vector<1x128x256xf32> to vector<128x256xf32>
    %18 = arith.truncf %17 : vector<128x256xf32> to vector<128x256xbf16>
    %c0_17 = arith.constant 0 : index
    %c0_18 = arith.constant 0 : index
    %19 = vector.load %arg6[%c0_17, %c0_18] : memref<256x256xbf16, #tpu.memory_space<vmem>>, vector<256x256xbf16>
    %cst_19 = arith.constant dense<0.000000e+00> : vector<128x256xf32>
    %20 = tpu.matmul %18, %19, %cst_19 {dimension_numbers = #tpu.dot_dimension_numbers<[1], [0], [0], [1], [0, 0, 1, 1], [], []>} : vector<128x256xbf16>, vector<256x256xbf16>, vector<128x256xf32> -> vector<128x256xf32>
    %c0_20 = arith.constant 0 : index
    %c0_21 = arith.constant 0 : index
    %21 = vector.load %arg10[%c0_20, %c0_21] : memref<1x256xf32, #tpu.memory_space<vmem>>, vector<1x256xf32>
    %22 = vector.broadcast %21 : vector<1x256xf32> to vector<128x256xf32>
    %23 = arith.addf %20, %22 : vector<128x256xf32>
    %24 = arith.truncf %7 : vector<128x256xf32> to vector<128x256xbf16>
    %25 = arith.truncf %15 : vector<128x256xf32> to vector<128x256xbf16>
    %26 = arith.truncf %23 : vector<128x256xf32> to vector<128x256xbf16>
    %27 = vector.extract_strided_slice %24 {offsets = [0, 0], sizes = [128, 128], strides = [1, 1]} : vector<128x256xbf16> to vector<128x128xbf16>
    %c0_22 = arith.constant 0 : index
    %c0_23 = arith.constant 0 : index
    %c0_24 = arith.constant 0 : index
    %28 = vector.load %arg13[%c0_22, %c0_23, %c0_24] : memref<2x128x128xbf16, #tpu.memory_space<vmem>>, vector<1x128x128xbf16>
    %29 = vector.shape_cast %28 : vector<1x128x128xbf16> to vector<128x128xbf16>
    %30 = vector.shape_cast %27 : vector<128x128xbf16> to vector<1x128x128xbf16>
    tpu.vector_store %arg13[%c0_22, %c0_23, %c0_24], %30 {strides = array<i32>} : memref<2x128x128xbf16, #tpu.memory_space<vmem>>, vector<1x128x128xbf16>,
    %31 = vector.extract_strided_slice %25 {offsets = [0, 0], sizes = [128, 128], strides = [1, 1]} : vector<128x256xbf16> to vector<128x128xbf16>
    %c0_25 = arith.constant 0 : index
    %c0_26 = arith.constant 0 : index
    %c0_27 = arith.constant 0 : index
    %32 = vector.load %arg14[%c0_25, %c0_26, %c0_27] : memref<2x128x128xbf16, #tpu.memory_space<vmem>>, vector<1x128x128xbf16>
    %33 = vector.shape_cast %32 : vector<1x128x128xbf16> to vector<128x128xbf16>
    %34 = vector.shape_cast %31 : vector<128x128xbf16> to vector<1x128x128xbf16>
    tpu.vector_store %arg14[%c0_25, %c0_26, %c0_27], %34 {strides = array<i32>} : memref<2x128x128xbf16, #tpu.memory_space<vmem>>, vector<1x128x128xbf16>,
    %35 = vector.extract_strided_slice %26 {offsets = [0, 0], sizes = [128, 128], strides = [1, 1]} : vector<128x256xbf16> to vector<128x128xbf16>
    %c0_28 = arith.constant 0 : index
    %c0_29 = arith.constant 0 : index
    %c0_30 = arith.constant 0 : index
    %36 = vector.load %arg15[%c0_28, %c0_29, %c0_30] : memref<2x128x128xbf16, #tpu.memory_space<vmem>>, vector<1x128x128xbf16>
    %37 = vector.shape_cast %36 : vector<1x128x128xbf16> to vector<128x128xbf16>
    %38 = vector.shape_cast %35 : vector<128x128xbf16> to vector<1x128x128xbf16>
    tpu.vector_store %arg15[%c0_28, %c0_29, %c0_30], %38 {strides = array<i32>} : memref<2x128x128xbf16, #tpu.memory_space<vmem>>, vector<1x128x128xbf16>,
    %39 = vector.extract_strided_slice %24 {offsets = [0, 128], sizes = [128, 128], strides = [1, 1]} : vector<128x256xbf16> to vector<128x128xbf16>
    %c1 = arith.constant 1 : index
    %c0_31 = arith.constant 0 : index
    %c0_32 = arith.constant 0 : index
    %40 = vector.load %arg13[%c1, %c0_31, %c0_32] : memref<2x128x128xbf16, #tpu.memory_space<vmem>>, vector<1x128x128xbf16>
    %41 = vector.shape_cast %40 : vector<1x128x128xbf16> to vector<128x128xbf16>
    %42 = vector.shape_cast %39 : vector<128x128xbf16> to vector<1x128x128xbf16>
    tpu.vector_store %arg13[%c1, %c0_31, %c0_32], %42 {strides = array<i32>} : memref<2x128x128xbf16, #tpu.memory_space<vmem>>, vector<1x128x128xbf16>,
    %43 = vector.extract_strided_slice %25 {offsets = [0, 128], sizes = [128, 128], strides = [1, 1]} : vector<128x256xbf16> to vector<128x128xbf16>
    %c1_33 = arith.constant 1 : index
    %c0_34 = arith.constant 0 : index
    %c0_35 = arith.constant 0 : index
    %44 = vector.load %arg14[%c1_33, %c0_34, %c0_35] : memref<2x128x128xbf16, #tpu.memory_space<vmem>>, vector<1x128x128xbf16>
    %45 = vector.shape_cast %44 : vector<1x128x128xbf16> to vector<128x128xbf16>
    %46 = vector.shape_cast %43 : vector<128x128xbf16> to vector<1x128x128xbf16>
    tpu.vector_store %arg14[%c1_33, %c0_34, %c0_35], %46 {strides = array<i32>} : memref<2x128x128xbf16, #tpu.memory_space<vmem>>, vector<1x128x128xbf16>,
    %47 = vector.extract_strided_slice %26 {offsets = [0, 128], sizes = [128, 128], strides = [1, 1]} : vector<128x256xbf16> to vector<128x128xbf16>
    %c1_36 = arith.constant 1 : index
    %c0_37 = arith.constant 0 : index
    %c0_38 = arith.constant 0 : index
    %48 = vector.load %arg15[%c1_36, %c0_37, %c0_38] : memref<2x128x128xbf16, #tpu.memory_space<vmem>>, vector<1x128x128xbf16>
    %49 = vector.shape_cast %48 : vector<1x128x128xbf16> to vector<128x128xbf16>
    %50 = vector.shape_cast %47 : vector<128x128xbf16> to vector<1x128x128xbf16>
    tpu.vector_store %arg15[%c1_36, %c0_37, %c0_38], %50 {strides = array<i32>} : memref<2x128x128xbf16, #tpu.memory_space<vmem>>, vector<1x128x128xbf16>,
    %c0_i32 = arith.constant 0 : i32
    %c2_i32 = arith.constant 2 : i32
    %51 = arith.addi %c0_i32, %c2_i32 : i32
    %c1_i32 = arith.constant 1 : i32
    scf.for %arg17 = %c0_i32 to %51 step %c1_i32  : i32 {
      %65 = arith.index_cast %arg17 : i32 to index
      %c0_54 = arith.constant 0 : index
      %c0_55 = arith.constant 0 : index
      %66 = vector.load %arg13[%65, %c0_54, %c0_55] : memref<2x128x128xbf16, #tpu.memory_space<vmem>>, vector<1x128x128xbf16>
      %67 = vector.shape_cast %66 : vector<1x128x128xbf16> to vector<128x128xbf16>
      %68 = arith.index_cast %arg17 : i32 to index
      %c0_56 = arith.constant 0 : index
      %c0_57 = arith.constant 0 : index
      %69 = vector.load %arg14[%68, %c0_56, %c0_57] : memref<2x128x128xbf16, #tpu.memory_space<vmem>>, vector<1x128x128xbf16>
      %70 = vector.shape_cast %69 : vector<1x128x128xbf16> to vector<128x128xbf16>
      %71 = arith.index_cast %arg17 : i32 to index
      %c0_58 = arith.constant 0 : index
      %c0_59 = arith.constant 0 : index
      %72 = vector.load %arg15[%71, %c0_58, %c0_59] : memref<2x128x128xbf16, #tpu.memory_space<vmem>>, vector<1x128x128xbf16>
      %73 = vector.shape_cast %72 : vector<1x128x128xbf16> to vector<128x128xbf16>
      %74 = tpu.transpose %70, [1, 0] : vector<128x128xbf16> -> vector<128x128xbf16>
      %cst_60 = arith.constant dense<0.000000e+00> : vector<128x128xf32>
      %75 = tpu.matmul %67, %74, %cst_60 {dimension_numbers = #tpu.dot_dimension_numbers<[1], [0], [0], [1], [0, 0, 1, 1], [], []>} : vector<128x128xbf16>, vector<128x128xbf16>, vector<128x128xf32> -> vector<128x128xf32>
      %cst_61 = arith.constant dense<0xFF800000> : vector<128xf32>
      %76 = vector.multi_reduction <maximumf>, %75, %cst_61 [1] : vector<128x128xf32> to vector<128xf32>
      %77 = vector.shape_cast %76 : vector<128xf32> to vector<128x1xf32>
      %78 = vector.broadcast %77 : vector<128x1xf32> to vector<128x128xf32>
      %79 = arith.subf %75, %78 : vector<128x128xf32>
      %80 = math.exp %79 : vector<128x128xf32>
      %cst_62 = arith.constant dense<0.000000e+00> : vector<128xf32>
      %81 = vector.multi_reduction <add>, %80, %cst_62 [1] : vector<128x128xf32> to vector<128xf32>
      %82 = vector.shape_cast %81 : vector<128xf32> to vector<128x1xf32>
      %83 = arith.truncf %80 : vector<128x128xf32> to vector<128x128xbf16>
      %cst_63 = arith.constant dense<0.000000e+00> : vector<128x128xf32>
      %84 = tpu.matmul %83, %73, %cst_63 {dimension_numbers = #tpu.dot_dimension_numbers<[1], [0], [0], [1], [0, 0, 1, 1], [], []>} : vector<128x128xbf16>, vector<128x128xbf16>, vector<128x128xf32> -> vector<128x128xf32>
      %85 = tpu.reciprocal %82 {approx = true} : vector<128x1xf32> -> vector<128x1xf32>
      %86 = vector.broadcast %85 : vector<128x1xf32> to vector<128x128xf32>
      %87 = arith.mulf %84, %86 : vector<128x128xf32>
      %88 = arith.truncf %87 : vector<128x128xf32> to vector<128x128xbf16>
      %89 = arith.index_cast %arg17 : i32 to index
      %c0_64 = arith.constant 0 : index
      %c0_65 = arith.constant 0 : index
      %90 = vector.load %arg16[%89, %c0_64, %c0_65] : memref<2x128x128xbf16, #tpu.memory_space<vmem>>, vector<1x128x128xbf16>
      %91 = vector.shape_cast %90 : vector<1x128x128xbf16> to vector<128x128xbf16>
      %92 = vector.shape_cast %88 : vector<128x128xbf16> to vector<1x128x128xbf16>
      tpu.vector_store %arg16[%89, %c0_64, %c0_65], %92 {strides = array<i32>} : memref<2x128x128xbf16, #tpu.memory_space<vmem>>, vector<1x128x128xbf16>,
    }
    %c2_i32_39 = arith.constant 2 : i32
    %c0_40 = arith.constant 0 : index
    %c0_41 = arith.constant 0 : index
    %c0_42 = arith.constant 0 : index
    %52 = vector.load %arg16[%c0_40, %c0_41, %c0_42] : memref<2x128x128xbf16, #tpu.memory_space<vmem>>, vector<1x128x128xbf16>
    %53 = vector.shape_cast %52 : vector<1x128x128xbf16> to vector<128x128xbf16>
    %c1_43 = arith.constant 1 : index
    %c0_44 = arith.constant 0 : index
    %c0_45 = arith.constant 0 : index
    %54 = vector.load %arg16[%c1_43, %c0_44, %c0_45] : memref<2x128x128xbf16, #tpu.memory_space<vmem>>, vector<1x128x128xbf16>
    %55 = vector.shape_cast %54 : vector<1x128x128xbf16> to vector<128x128xbf16>
    %56 = tpu.concatenate %53, %55 in 1 : vector<128x128xbf16>, vector<128x128xbf16> -> vector<128x256xbf16>
    %c0_46 = arith.constant 0 : index
    %c0_47 = arith.constant 0 : index
    %57 = vector.load %arg7[%c0_46, %c0_47] : memref<256x256xbf16, #tpu.memory_space<vmem>>, vector<256x256xbf16>
    %cst_48 = arith.constant dense<0.000000e+00> : vector<128x256xf32>
    %58 = tpu.matmul %56, %57, %cst_48 {dimension_numbers = #tpu.dot_dimension_numbers<[1], [0], [0], [1], [0, 0, 1, 1], [], []>} : vector<128x256xbf16>, vector<256x256xbf16>, vector<128x256xf32> -> vector<128x256xf32>
    %c0_49 = arith.constant 0 : index
    %c0_50 = arith.constant 0 : index
    %59 = vector.load %arg11[%c0_49, %c0_50] : memref<1x256xf32, #tpu.memory_space<vmem>>, vector<1x256xf32>
    %60 = vector.broadcast %59 : vector<1x256xf32> to vector<128x256xf32>
    %61 = arith.addf %58, %60 : vector<128x256xf32>
    %c0_51 = arith.constant 0 : index
    %c0_52 = arith.constant 0 : index
    %c0_53 = arith.constant 0 : index
    %62 = vector.load %arg12[%c0_51, %c0_52, %c0_53] : memref<1x128x256xf32, #tpu.memory_space<vmem>>, vector<1x128x256xf32>
    %63 = vector.shape_cast %62 : vector<1x128x256xf32> to vector<128x256xf32>
    %64 = vector.shape_cast %61 : vector<128x256xf32> to vector<1x128x256xf32>
    tpu.vector_store %arg12[%c0_51, %c0_52, %c0_53], %64 {strides = array<i32>} : memref<1x128x256xf32, #tpu.memory_space<vmem>>, vector<1x128x256xf32>,
    return
  }
  func.func @transform_0(%arg0: i32) -> (i32, i32, i32) {
    %c0_i32 = arith.constant 0 : i32
    %c0_i32_0 = arith.constant 0 : i32
    %c0_i32_1 = arith.constant 0 : i32
    return %arg0, %c0_i32, %c0_i32_0 : i32, i32, i32
  }
  func.func @transform_1(%arg0: i32) -> (i32, i32, i32) {
    %c0_i32 = arith.constant 0 : i32
    %c0_i32_0 = arith.constant 0 : i32
    %c0_i32_1 = arith.constant 0 : i32
    return %arg0, %c0_i32, %c0_i32_0 : i32, i32, i32
  }
  func.func @transform_2(%arg0: i32) -> (i32, i32, i32) {
    %c0_i32 = arith.constant 0 : i32
    %c0_i32_0 = arith.constant 0 : i32
    %c0_i32_1 = arith.constant 0 : i32
    return %arg0, %c0_i32, %c0_i32_0 : i32, i32, i32
  }
  func.func @transform_3(%arg0: i32) -> (i32, i32) {
    %c0_i32 = arith.constant 0 : i32
    %c0_i32_0 = arith.constant 0 : i32
    %c0_i32_1 = arith.constant 0 : i32
    return %c0_i32, %c0_i32_0 : i32, i32
  }
  func.func @transform_4(%arg0: i32) -> (i32, i32) {
    %c0_i32 = arith.constant 0 : i32
    %c0_i32_0 = arith.constant 0 : i32
    %c0_i32_1 = arith.constant 0 : i32
    return %c0_i32, %c0_i32_0 : i32, i32
  }
  func.func @transform_5(%arg0: i32) -> (i32, i32) {
    %c0_i32 = arith.constant 0 : i32
    %c0_i32_0 = arith.constant 0 : i32
    %c0_i32_1 = arith.constant 0 : i32
    return %c0_i32, %c0_i32_0 : i32, i32
  }
  func.func @transform_6(%arg0: i32) -> (i32, i32) {
    %c0_i32 = arith.constant 0 : i32
    %c0_i32_0 = arith.constant 0 : i32
    %c0_i32_1 = arith.constant 0 : i32
    return %c0_i32, %c0_i32_0 : i32, i32
  }
  func.func @transform_7(%arg0: i32) -> (i32, i32) {
    %c0_i32 = arith.constant 0 : i32
    %c0_i32_0 = arith.constant 0 : i32
    %c0_i32_1 = arith.constant 0 : i32
    return %c0_i32, %c0_i32_0 : i32, i32
  }
  func.func @transform_8(%arg0: i32) -> (i32, i32) {
    %c0_i32 = arith.constant 0 : i32
    %c0_i32_0 = arith.constant 0 : i32
    %c0_i32_1 = arith.constant 0 : i32
    return %c0_i32, %c0_i32_0 : i32, i32
  }
  func.func @transform_9(%arg0: i32) -> (i32, i32) {
    %c0_i32 = arith.constant 0 : i32
    %c0_i32_0 = arith.constant 0 : i32
    %c0_i32_1 = arith.constant 0 : i32
    return %c0_i32, %c0_i32_0 : i32, i32
  }
  func.func @transform_10(%arg0: i32) -> (i32, i32) {
    %c0_i32 = arith.constant 0 : i32
    %c0_i32_0 = arith.constant 0 : i32
    %c0_i32_1 = arith.constant 0 : i32
    return %c0_i32, %c0_i32_0 : i32, i32
  }
  func.func @transform_11(%arg0: i32) -> (i32, i32, i32) {
    %c0_i32 = arith.constant 0 : i32
    %c0_i32_0 = arith.constant 0 : i32
    %c0_i32_1 = arith.constant 0 : i32
    return %arg0, %c0_i32, %c0_i32_0 : i32, i32, i32
  }
}

</mosaic_0001>

<bundles_post_ra>
// kernel: tpu_custom_call.1
= control target key start
LH: loop header
LB: loop body
LE: loop exit
PB: predicated region body
PF: predicated region fallthrough
CT: control target
= control target key end

     0   :  { %s5795_s0 = inlined_call_operand.hbm [shape: f32[2,128,256], index: 0, kind: input, shape index: {}]   ;;  %s5796_s1 = inlined_call_operand.hbm [shape: f32[2,128,256], index: 1, kind: input, shape index: {}]   ;;  %s5797_s2 = inlined_call_operand.hbm [shape: f32[2,128,256], index: 2, kind: input, shape index: {}]   ;;  %s5798_s3 = inlined_call_operand.hbm [shape: bf16[256,256], index: 3, kind: input, shape index: {}]   ;;  %s5799_s4 = inlined_call_operand.hbm [shape: bf16[256,256], index: 4, kind: input, shape index: {}]   ;;  %s5800_s5 = inlined_call_operand.hbm [shape: bf16[256,256], index: 5, kind: input, shape index: {}]   ;;  %s5801_s6 = inlined_call_operand.hbm [shape: bf16[256,256], index: 6, kind: input, shape index: {}]   ;;  %s5802_s7 = inlined_call_operand.vmem [shape: f32[1,256], index: 7, kind: input, shape index: {}]   ;;  %s5803_s8 = inlined_call_operand.vmem [shape: f32[1,256], index: 8, kind: input, shape index: {}]   ;;  %s5804_s9 = inlined_call_operand.vmem [shape: f32[1,256], index: 9, kind: input, shape index: {}]   ;;  %s5805_s10 = inlined_call_operand.vmem [shape: f32[1,256], index: 10, kind: input, shape index: {}]   ;;  %s5806_s11 = inlined_call_operand.hbm [shape: f32[2,128,256], index: 11, kind: output, shape index: {}]  }
   0x1   :  { %5831 = sst [smem:[#allocation30_spill]] %s5795_s0 }
   0x2   :  { %5832 = sst [smem:[#allocation31_spill]] %s5798_s3 }
   0x3   :  { %5833 = sst [smem:[#allocation32_spill]] %s5800_s5 }
   0x4   :  { %5834 = sst [smem:[#allocation33_spill]] %s5806_s11 }
   0x5   :  { %16 = vsyncpa [#allocation7], 0 }
   0x6   :  { %18 = vsyncpa [#allocation7 + $0x1], 0 }
   0x7   :  { %19 = vsyncpa [#allocation10], 0 }
   0x8   :  { %21 = vsyncpa [#allocation10 + $0x1], 0 }
   0x9   :  { %22 = vsyncpa [#allocation13], 0 }
   0xa   :  { %23 = vsyncpa [#allocation16], 0 }
   0xb   :  { %24 = vsyncpa [#allocation8], 0 }
   0xc   :  { %26 = vsyncpa [#allocation8 + $0x1], 0  ;;  %s5090_s17 = smov 0   ;;  %s5092_s18 = smov 0  }
   0xd   :  { %s5094_s19 = smov 0   ;;  %s5096_s20 = smov 0  }
   0xe LB: > { %5835 = sst [smem:[#allocation24_spill]] %s4998_s17  ;;  %s5111_s21 = sadd.s32 4294967295, %s5010_s20   ;;  %s5010_s20 = sphi %s5096_s20, %s5873_s20   ;;  %s5006_s19 = sphi %s5094_s19, %s5877_s19   ;;  %s5002_s18 = sphi %s5092_s18, %s5876_s18   ;;  %s4998_s17 = sphi %s5090_s17, %s5875_s17  }
   0xf   : > { %5836 = sst [smem:[#allocation25_spill]] %s5010_s20  ;;  %s3411_s22 = sadd.s32 4294967294, %s5010_s20  }
  0x10   : > { %p52_p0 = scmp.ne.s32.totalorder %s5002_s18, %s4998_s17  ;;  %p5818_p1 = scmp.eq.s32.totalorder %s5111_s21, 0 }
  0x11   : > { %p296_p2 = scmp.eq.s32.totalorder %s5111_s21, 1  ;;  %p302_p3 = scmp.eq.s32.totalorder %s3411_s22, 1 }
  0x12   : > { %p5120_p4 = por %p5818_p1, %p52_p0  ;;  %p3412_p5 = scmp.ge.s32.totalorder %s5010_s20, 1 }
  0x13   : > { %p5125_p6 = por %p302_p3, %p52_p0  ;;  %p309_p7 = scmp.lt.s32.totalorder %s5010_s20, 3 }
  0x14   : > { %s5837_s23 = scalar_select %p5120_p4, 1, 0 }
  0x15   : > { %s5838_s24 = scalar_select %p5125_p6, 1, 0 }
  0x16   : > { %p5130_p8 = pnand %p3412_p5, %p309_p7  ;;  %s5016_s26 = smov [#allocation12]  }
  0x17   : > { %5839 = sst [smem:[#allocation26_spill]] %s5838_s24  ;;  %s321_s27 = sshll.u32 %s5016_s26, 4  ;;  %s322_s27 = int_to_ptr.vmem [resolvable:$true] %s321_s27 }
  0x18   : > { %s5840_s25 = scalar_select %p5130_p8, 1, 0 }
  0x19   : > { %p4359_p9 = pneg %p5130_p8  ;;  %s5017_s29 = smov [#allocation15]  }
  0x1a   : > { %s347_s30 = sshll.u32 %s5017_s29, 4  ;;  %s4753_s12 = scalar_lea.vmem %s322_s27, 4096  ;;  %s348_s30 = int_to_ptr.vmem [resolvable:$true] %s347_s30 }
  0x1b   : > { %p5139_p11 = pnand %p4359_p9, %p5818_p1  ;;  %p4754_p13 = scmp.ne.s32.totalorder %s322_s27, %s4753_s12 }
  0x1c   : > { %p4761_p5 = scmp.lt.s32.totalorder %s322_s27, %s322_s27  ;;  %p4762_p7 = scmp.lt.s32.totalorder %s4753_s12, %s4753_s12 }
  0x1d   : > { %s5841_s28 = scalar_select %p5139_p11, 1, 0 }
  0x1e   : > { %p5819_p12 = pneg %p5139_p11  ;;  %p4763_p10 = por %p4762_p7, %p4761_p5 }
  0x20   : > { %p4756_p0 = pnand %p4754_p13, %p5819_p12 }
  0x22   : > { %p4757_p3 = pneg %p4756_p0 }
  0x24   : > { %p4764_p9 = pnand %p4763_p10, %p4757_p3 }
  0x26   : > { %4767 = shalt.err (!%p4764_p9)
}
  0x27   : > { %s5807_s13 = smov 128   ;;  %s5809_s14 = smov 8  }
  0x28   : > { %s5842_s3 = sld [smem:[#allocation31_spill]]  ;;  %s4779_s22 = scalar_lea.vmem %s348_s30, 4096 }
  0x29   : > { %p4780_p13 = scmp.ne.s32.totalorder %s348_s30, %s4779_s22  ;;  %p4787_p10 = scmp.lt.s32.totalorder %s348_s30, %s348_s30 }
  0x2a   : > { %p4788_p3 = scmp.lt.s32.totalorder %s4779_s22, %s4779_s22 }
  0x2b   : > { %p4782_p0 = pnand %p4780_p13, %p5819_p12 }
  0x2c   : > { %p4789_p7 = por %p4788_p3, %p4787_p10 }
  0x2d   : > { %p4783_p5 = pneg %p4782_p0 }
  0x2e   : > { %4362 = dma.hbm_to_vmem [thread:$0]  (!%p5139_p11), %s5842_s3, 4096, %s322_s27, [#allocation13], %s5807_s13, %s5807_s13, %s5809_s14  }
  0x2f   : > { %p4790_p9 = pnand %p4789_p7, %p4783_p5 }
  0x31   : > { %4793 = shalt.err (!%p4790_p9)
}
  0x32   : > { %s5843_s5 = sld [smem:[#allocation32_spill]]  ;;  %s5168_s27 = sadd.s32 1, %s5010_s20  }
  0x33   : > { %5844 = sst [smem:[#allocation27_spill]] %s5168_s27  ;;  %s39_s12 = sadd.s32 1, %s5006_s19 }
  0x34   : > { %s36_s15 = ssub.s32 %s5010_s20, %s5168_s27  ;;  %p46_p13 = scmp.ne.s32.totalorder %s5006_s19, %s5002_s18 }
  0x35   : > { %p37_p0 = scmp.eq.s32.totalorder %s36_s15, 0  ;;  %p47_p5 = scmp.eq.s32.totalorder %s5010_s20, 0 }
  0x36   : > { %p5178_p10 = por %p296_p2, %p46_p13  ;;  %p4390_p3 = scmp.lt.s32.totalorder %s5010_s20, 2 }
  0x37   : > { %s5184_s22 = scalar_select %p37_p0, %s5006_s19, %s39_s12  }
  0x38   : > { %4368 = dma.hbm_to_vmem [thread:$0]  (!%p5139_p11), %s5843_s5, 4096, %s348_s30, [#allocation16], %s5807_s13, %s5807_s13, %s5809_s14  }
  0x39   : > { %s5845_s16 = scalar_select %p5178_p10, 1, 0 }
  0x3a   : > { %5847 = sst [smem:[#allocation29_spill]] %s5184_s22  ;;  %p48_p7 = por %p47_p5, %p46_p13 }
  0x3b   : > { %5846 = sst [smem:[#allocation28_spill]] %s5845_s16  ;;  %s5811_s26 = sand.u32 1, %s5006_s19  }
  0x3c   : > { %s5189_s30 = sshll.u32 %s5811_s26, 8  ;;  %s5192_s29 = sshll.u32 %s5010_s20, 12 }
  0x3d   : > { %p5194_p9 = pnand %p4390_p3, %p48_p7  ;;  %s407_s13 = sand.u32 1, %s5010_s20  }
  0x3e   : > { %s5203_s12 = scalar_lea.hbm %s5796_s1, %s5192_s29  ;;  %s411_s26 = scalar_lea.vmem [#allocation9], %s5189_s30 }
  0x3f   : > { %s418_s5 = sshll.u32 %s411_s26, 4  ;;  %s5020_s22 = smov [#allocation14]   ;;  %s5206_s5 = int_to_ptr.vmem [resolvable:$true] %s418_s5 }
  0x40   : > { %s5208_s27 = sshll.u32 %s5020_s22, 4  ;;  %s5210_s24 = scalar_lea.sflag [#allocation10], %s407_s13  ;;  %s335_s27 = int_to_ptr.vmem [resolvable:$true] %s5208_s27 }
  0x41   : > { %s4794_s17 = scalar_lea.hbm %s5203_s12, 4096  ;;  %p5216_p13 = pneg %p5194_p9 }
  0x42   : > { %p4795_p2 = scmp.ne.s32.totalorder %s5203_s12, %s4794_s17  ;;  %s4799_s26 = scalar_lea.hbm %s5796_s1, 8192 }
  0x43   : > { %p4800_p3 = scmp.lt.s32.totalorder %s5203_s12, %s5796_s1  ;;  %p4801_p7 = scmp.lt.s32.totalorder %s4799_s26, %s4794_s17 }
  0x44   : > { %p4797_p0 = pnand %p5216_p13, %p4795_p2 }
  0x45   : > { %p4802_p1 = por %p4801_p7, %p4800_p3 }
  0x46   : > { %p4798_p5 = pneg %p4797_p0 }
  0x48   : > { %p4803_p12 = pnand %p4802_p1, %p4798_p5 }
  0x4a   : > { %4806 = shalt.err (!%p4803_p12)
}
  0x4b   : > { %s4807_s13 = scalar_lea.vmem %s5206_s5, 4096  ;;  %s5021_s16 = smov [#allocation9]  }
  0x4c   : > { %p4808_p6 = scmp.ne.s32.totalorder %s5206_s5, %s4807_s13  ;;  %s4812_s3 = sshll.u32 %s5021_s16, 4  ;;  %s4813_s3 = int_to_ptr.vmem [resolvable:$false] %s4812_s3 }
  0x4d   : > { %s4814_s14 = scalar_lea.vmem %s4813_s3, 8192  ;;  %p4815_p10 = scmp.lt.s32.totalorder %s5206_s5, %s4813_s3 }
  0x4e   : > { %p4810_p2 = pnand %p4808_p6, %p5216_p13  ;;  %p4816_p4 = scmp.lt.s32.totalorder %s4814_s14, %s4807_s13 }
  0x50   : > { %p4811_p0 = pneg %p4810_p2  ;;  %p4817_p8 = por %p4816_p4, %p4815_p10 }
  0x52   : > { %p4818_p11 = pnand %p4817_p8, %p4811_p0 }
  0x54   : > { %4821 = shalt.err (!%p4818_p11)
}
  0x55   : > { %s5827_s11 = smov 256   ;;  %s5829_s17 = smov 16  }
  0x56   : > { %4378 = dma.hbm_to_vmem [thread:$0]  (!%p5194_p9), %s5203_s12, 4096, %s5206_s5, %s5210_s24, %s5827_s11, %s5827_s11, %s5829_s17  }
  0x57   : > { %s4833_s16 = scalar_lea.vmem %s335_s27, 4096  ;;  %p5850_p6 = scmp.ne.s32.totalorder %s5841_s28, 0 }
  0x58   : > { %p4834_p1 = scmp.ne.s32.totalorder %s335_s27, %s4833_s16  ;;  %p4841_p12 = scmp.lt.s32.totalorder %s335_s27, %s335_s27 }
  0x59   : > { %p5851_p4 = pneg %p5850_p6  ;;  %p4842_p10 = scmp.lt.s32.totalorder %s4833_s16, %s4833_s16 }
  0x5b   : > { %p4836_p8 = pnand %p4834_p1, %p5851_p4  ;;  %p4843_p5 = por %p4842_p10, %p4841_p12 }
  0x5d   : > { %p4837_p11 = pneg %p4836_p8 }
  0x5f   : > { %p4844_p3 = pnand %p4843_p5, %p4837_p11 }
  0x61   : > { %4847 = shalt.err (!%p4844_p3)
}
  0x62   : > { %s5852_s26 = smov 8   ;;  %s5853_s22 = smov 128  }
  0x63   : > { %4365 = dma.hbm_to_vmem [thread:$0]  (!%p5850_p6), %s5799_s4, 4096, %s335_s27, [#allocation13], %s5853_s22, %s5853_s22, %s5852_s26  }
  0x64   : > { %s5024_s5 = smov [#allocation17]   ;;  %p5854_p2 = pmov %p5851_p4 }
  0x65   : > { %s360_s12 = sshll.u32 %s5024_s5, 4  ;;  %s361_s12 = int_to_ptr.vmem [resolvable:$true] %s360_s12 }
  0x66   : > { %s4859_s14 = scalar_lea.vmem %s361_s12, 4096  ;;  %p4867_p4 = scmp.lt.s32.totalorder %s361_s12, %s361_s12 }
  0x67   : > { %p4860_p7 = scmp.ne.s32.totalorder %s361_s12, %s4859_s14  ;;  %p4868_p8 = scmp.lt.s32.totalorder %s4859_s14, %s4859_s14 }
  0x69   : > { %p4862_p0 = pnand %p4860_p7, %p5854_p2  ;;  %p4869_p11 = por %p4868_p8, %p4867_p4 }
  0x6b   : > { %p4863_p1 = pneg %p4862_p0 }
  0x6d   : > { %p4870_p12 = pnand %p4869_p11, %p4863_p1 }
  0x6f   : > { %4873 = shalt.err (!%p4870_p12)
}
  0x70   : > { %4371 = dma.hbm_to_vmem [thread:$0]  (!%p5850_p6), %s5801_s6, 4096, %s361_s12, [#allocation16], %s5853_s22, %s5853_s22, %s5852_s26  }
  0x71   : > { %s5855_s0 = sld [smem:[#allocation30_spill]]  ;;  %s390_s28 = scalar_lea.vmem [#allocation6], %s5189_s30 }
  0x72   : > { %s397_s14 = sshll.u32 %s390_s28, 4  ;;  %s5856_s11 = sand.u32 1, %s5006_s19   ;;  %s5272_s14 = int_to_ptr.vmem [resolvable:$true] %s397_s14 }
  0x73   : > { %s387_s17 = scalar_lea.sflag [#allocation7], %s5856_s11 }
  0x77   : > { %s5269_s5 = scalar_lea.hbm %s5855_s0, %s5192_s29  ;;  %s4879_s12 = scalar_lea.hbm %s5855_s0, 8192 }
  0x78   : > { %s4874_s27 = scalar_lea.hbm %s5269_s5, 4096  ;;  %p4880_p6 = scmp.lt.s32.totalorder %s5269_s5, %s5855_s0 }
  0x79   : > { %p4875_p10 = scmp.ne.s32.totalorder %s5269_s5, %s4874_s27  ;;  %p4881_p7 = scmp.lt.s32.totalorder %s4879_s12, %s4874_s27 }
  0x7b   : > { %p4877_p5 = pnand %p4875_p10, %p5216_p13  ;;  %p4882_p2 = por %p4881_p7, %p4880_p6 }
  0x7d   : > { %p4878_p3 = pneg %p4877_p5 }
  0x7f   : > { %p4883_p0 = pnand %p4882_p2, %p4878_p3 }
  0x81   : > { %4886 = shalt.err (!%p4883_p0)
}
  0x82   : > { %s4887_s11 = scalar_lea.vmem %s5272_s14, 4096  ;;  %s5025_s3 = smov [#allocation6]  }
  0x83   : > { %p4888_p1 = scmp.ne.s32.totalorder %s5272_s14, %s4887_s11  ;;  %s4892_s28 = sshll.u32 %s5025_s3, 4  ;;  %s4893_s28 = int_to_ptr.vmem [resolvable:$false] %s4892_s28 }
  0x84   : > { %s4894_s26 = scalar_lea.vmem %s4893_s28, 8192  ;;  %p4895_p11 = scmp.lt.s32.totalorder %s5272_s14, %s4893_s28 }
  0x85   : > { %p4890_p4 = pnand %p4888_p1, %p5216_p13  ;;  %p4896_p12 = scmp.lt.s32.totalorder %s4894_s26, %s4887_s11 }
  0x87   : > { %p4891_p8 = pneg %p4890_p4  ;;  %p4897_p10 = por %p4896_p12, %p4895_p11 }
  0x89   : > { %p4898_p5 = pnand %p4897_p10, %p4891_p8 }
  0x8b   : > { %4901 = shalt.err (!%p4898_p5)
}
  0x8c   : > { %s5857_s27 = smov 16   ;;  %s5858_s22 = smov 256  }
  0x8d   : > { %4375 = dma.hbm_to_vmem [thread:$0]  (!%p5194_p9), %s5269_s5, 4096, %s5272_s14, %s387_s17, %s5858_s22, %s5858_s22, %s5857_s27  }
  0x8e   : > { %s5303_s13 = scalar_lea.hbm %s5797_s2, %s5192_s29  ;;  %s432_s11 = scalar_lea.vmem [#allocation11], %s5189_s30 }
  0x8f   : > { %s439_s3 = sshll.u32 %s432_s11, 4  ;;  %s4902_s28 = scalar_lea.hbm %s5303_s13, 4096  ;;  %s440_s3 = int_to_ptr.vmem [resolvable:$true] %s439_s3 }
  0x90   : > { %p4903_p3 = scmp.ne.s32.totalorder %s5303_s13, %s4902_s28  ;;  %s4907_s17 = scalar_lea.hbm %s5797_s2, 8192 }
  0x91   : > { %p4908_p2 = scmp.lt.s32.totalorder %s5303_s13, %s5797_s2  ;;  %p4909_p0 = scmp.lt.s32.totalorder %s4907_s17, %s4902_s28 }
  0x92   : > { %p4905_p6 = pnand %p4903_p3, %p5216_p13 }
  0x93   : > { %p4910_p1 = por %p4909_p0, %p4908_p2 }
  0x94   : > { %p4906_p7 = pneg %p4905_p6 }
  0x96   : > { %p4911_p4 = pnand %p4910_p1, %p4906_p7 }
  0x98   : > { %4914 = shalt.err (!%p4911_p4)
}
  0x99   : > { %s4915_s30 = scalar_lea.vmem %s440_s3, 4096  ;;  %s5026_s29 = smov [#allocation11]  }
  0x9a   : > { %p4916_p8 = scmp.ne.s32.totalorder %s440_s3, %s4915_s30  ;;  %s4920_s12 = sshll.u32 %s5026_s29, 4  ;;  %s4921_s12 = int_to_ptr.vmem [resolvable:$false] %s4920_s12 }
  0x9b   : > { %s4922_s16 = scalar_lea.vmem %s4921_s12, 8192  ;;  %p4923_p10 = scmp.lt.s32.totalorder %s440_s3, %s4921_s12 }
  0x9c   : > { %p4918_p11 = pnand %p4916_p8, %p5216_p13  ;;  %p4924_p5 = scmp.lt.s32.totalorder %s4922_s16, %s4915_s30 }
  0x9e   : > { %p4919_p12 = pneg %p4918_p11  ;;  %p4925_p3 = por %p4924_p5, %p4923_p10 }
  0xa0   : > { %p4926_p6 = pnand %p4925_p3, %p4919_p12 }
  0xa2   : > { %4929 = shalt.err (!%p4926_p6)
}
  0xa3   : > { %4381 = dma.hbm_to_vmem [thread:$0]  (!%p5194_p9), %s5303_s13, 4096, %s440_s3, %s5210_s24, %s5858_s22, %s5858_s22, %s5857_s27  }
  0xa4   : > { %p5859_p13 = scmp.ne.s32.totalorder %s5840_s25, 0 }
  0xa5   : > { %s5329_s0 = sand.u32 (!%p5859_p13), 1, %s5002_s18   ;;  %p5860_p7 = scmp.ne.s32.totalorder (!%p5859_p13), %s5837_s23, 0 }
  0xa6   : > { %451 = sbr.rel (%p5859_p13) target bundleno = 1463 (0x5b7), region = 64  ;;  %s5332_s20 = sshll.u32 (!%p5859_p13), %s5329_s0, 8 }
  0xa7   : > { %s454_s11 = scalar_lea.sflag (!%p5859_p13), [#allocation7], %s5329_s0  ;;  %s5336_s15 = scalar_lea.vmem (!%p5859_p13), [#allocation6], %s5332_s20 }
  0xab   : > { %4977 = dma.done.wait (%p5860_p7), %s454_s11, 4096  }
  0xac   : > { %4979 = vsyncadd (%p5860_p7), %s454_s11, 4294963200  ;;  %s462_s24 = sand.u32 1, %s5111_s21   ;;  %s5344_s27 = scalar_lea.vmem [#allocation9], %s5332_s20 }
  0xad   : > { %s463_s25 = scalar_lea.sflag [#allocation10], %s462_s24 }
  0xae   : > { %4981 = dma.done.wait (%p5860_p7), %s463_s25, 8192  }
  0xaf   : > { %4983 = vsyncadd (%p5860_p7), %s463_s25, 4294959104  ;;  %s5351_s22 = scalar_lea.vmem [#allocation11], %s5332_s20  ;;  %p5861_p9 = scmp.eq.s32.totalorder %s5111_s21, 0 }
  0xb1   : > { %4985 = dma.done.wait (%p5861_p9), [#allocation13], 8192   ;;  %p5862_p2 = pmov %p5861_p9 }
  0xb3   : > { %4987 = vsyncadd (%p5862_p2), [#allocation13], 4294959104  ;;  %p5863_p0 = pmov %p5862_p2 }
  0xb5   : > { %4989 = dma.done.wait (%p5863_p0), [#allocation16], 8192   ;;  %p5864_p1 = pmov %p5863_p0 }
  0xb6   : > { %v4446_v0 = vld [vmem:[#allocation12 + $0x74] ss:$8 sps:$4 sm:$0xff]   ;;  %v4450_v2 = vld [vmem:[#allocation12 + $0x70] ss:$8 sps:$4 sm:$0xff]   ;;  %v4452_v4 = vld [vmem:[#allocation12 + $0x64] ss:$8 sps:$4 sm:$0xff]  }
  0xb7   : > { %4991 = vsyncadd (%p5864_p1), [#allocation16], 4294959104  ;;  %v4448_v1 = vld [vmem:[#allocation14 + $0x74] ss:$8 sps:$4 sm:$0xff]   ;;  %793 = vmatprep.subr.bf16.mxu0 %v4446_v0  ;;  %v4451_v3 = vld [vmem:[#allocation14 + $0x70] ss:$8 sps:$4 sm:$0xff]  }
  0xb8   : > { %1158 = vmatprep.subr.bf16.mxu1 %v4448_v1  ;;  %794 = vmatpush1.bf16.msra.mxu0 %v4450_v2  ;;  %v4454_v5 = vld [vmem:[#allocation14 + $0x64] ss:$8 sps:$4 sm:$0xff]   ;;  %v4456_v6 = vld [vmem:[#allocation12 + $0x60] ss:$8 sps:$4 sm:$0xff]   ;;  %v4458_v8 = vld [vmem:[#allocation12 + $0x54] ss:$8 sps:$4 sm:$0xff]  }
  0xb9   : > { %1159 = vmatpush1.bf16.msra.mxu1 %v4451_v3  ;;  %795 = vmatprep.subr.bf16.mxu0 %v4452_v4  ;;  %v4457_v7 = vld [vmem:[#allocation14 + $0x60] ss:$8 sps:$4 sm:$0xff]   ;;  %v4460_v9 = vld [vmem:[#allocation14 + $0x54] ss:$8 sps:$4 sm:$0xff]   ;;  %v4462_v10 = vld [vmem:[#allocation12 + $0x50] ss:$8 sps:$4 sm:$0xff]  }
  0xba   : > { %1160 = vmatprep.subr.bf16.mxu1 %v4454_v5  ;;  %v4463_v11 = vld [vmem:[#allocation14 + $0x50] ss:$8 sps:$4 sm:$0xff]   ;;  %v4464_v12 = vld [vmem:[#allocation12 + $0x44] ss:$8 sps:$4 sm:$0xff]   ;;  %v4468_v14 = vld [vmem:[#allocation12 + $0x40] ss:$8 sps:$4 sm:$0xff]  }
  0xbb   : > { %v4466_v13 = vld [vmem:[#allocation14 + $0x44] ss:$8 sps:$4 sm:$0xff]   ;;  %v4469_v15 = vld [vmem:[#allocation14 + $0x40] ss:$8 sps:$4 sm:$0xff]   ;;  %v4470_v16 = vld [vmem:[#allocation12 + $0x34] ss:$8 sps:$4 sm:$0xff]  }
  0xbc   : > { %796 = vmatpush1.bf16.msra.mxu0 %v4456_v6  ;;  %v4472_v17 = vld [vmem:[#allocation14 + $0x34] ss:$8 sps:$4 sm:$0xff]   ;;  %v4474_v18 = vld [vmem:[#allocation12 + $0x30] ss:$8 sps:$4 sm:$0xff]   ;;  %v4476_v20 = vld [vmem:[#allocation12 + $0x24] ss:$8 sps:$4 sm:$0xff]  }
  0xbd   : > { %1161 = vmatpush1.bf16.msra.mxu1 %v4457_v7  ;;  %797 = vmatprep.subr.bf16.mxu0 %v4458_v8  ;;  %v4475_v19 = vld [vmem:[#allocation14 + $0x30] ss:$8 sps:$4 sm:$0xff]   ;;  %v4478_v21 = vld [vmem:[#allocation14 + $0x24] ss:$8 sps:$4 sm:$0xff]   ;;  %v4480_v22 = vld [vmem:[#allocation12 + $0x20] ss:$8 sps:$4 sm:$0xff]  }
  0xbe   : > { %1162 = vmatprep.subr.bf16.mxu1 %v4460_v9  ;;  %v4481_v23 = vld [vmem:[#allocation14 + $0x20] ss:$8 sps:$4 sm:$0xff]   ;;  %v4482_v24 = vld [vmem:[#allocation12 + $0x14] ss:$8 sps:$4 sm:$0xff]   ;;  %v4486_v26 = vld [vmem:[#allocation12 + $0x10] ss:$8 sps:$4 sm:$0xff]  }
  0xbf   : > { %v4484_v25 = vld [vmem:[#allocation14 + $0x14] ss:$8 sps:$4 sm:$0xff]   ;;  %v4487_v27 = vld [vmem:[#allocation14 + $0x10] ss:$8 sps:$4 sm:$0xff]   ;;  %v4488_v28 = vld [vmem:[#allocation12 + $0x4] ss:$8 sps:$4 sm:$0xff]  }
  0xc0   : > { %798 = vmatpush1.bf16.msra.mxu0 %v4462_v10  ;;  %v4490_v29 = vld [vmem:[#allocation14 + $0x4] ss:$8 sps:$4 sm:$0xff]   ;;  %v4492_v30 = vld [vmem:[#allocation12] ss:$8 sps:$4 sm:$0xff]   ;;  %v4494_v32 = vld [vmem:[#allocation12 + $0xf4] ss:$8 sps:$4 sm:$0xff]  }
  0xc1   : > { %1163 = vmatpush1.bf16.msra.mxu1 %v4463_v11  ;;  %799 = vmatprep.subr.bf16.mxu0 %v4464_v12  ;;  %v4493_v31 = vld [vmem:[#allocation14] ss:$8 sps:$4 sm:$0xff]   ;;  %v4496_v33 = vld [vmem:[#allocation14 + $0xf4] ss:$8 sps:$4 sm:$0xff]   ;;  %v4498_v34 = vld [vmem:[#allocation12 + $0xf0] ss:$8 sps:$4 sm:$0xff]  }
  0xc2   : > { %1164 = vmatprep.subr.bf16.mxu1 %v4466_v13  ;;  %v4499_v35 = vld [vmem:[#allocation14 + $0xf0] ss:$8 sps:$4 sm:$0xff]   ;;  %v4500_v36 = vld [vmem:[#allocation12 + $0xe4] ss:$8 sps:$4 sm:$0xff]   ;;  %v4504_v38 = vld [vmem:[#allocation12 + $0xe0] ss:$8 sps:$4 sm:$0xff]  }
  0xc3   : > { %v4502_v37 = vld [vmem:[#allocation14 + $0xe4] ss:$8 sps:$4 sm:$0xff]   ;;  %v4505_v39 = vld [vmem:[#allocation14 + $0xe0] ss:$8 sps:$4 sm:$0xff]   ;;  %v4506_v40 = vld [vmem:[#allocation12 + $0xd4] ss:$8 sps:$4 sm:$0xff]  }
  0xc4   : > { %800 = vmatpush1.bf16.msra.mxu0 %v4468_v14  ;;  %v4508_v41 = vld [vmem:[#allocation14 + $0xd4] ss:$8 sps:$4 sm:$0xff]   ;;  %v4510_v42 = vld [vmem:[#allocation12 + $0xd0] ss:$8 sps:$4 sm:$0xff]   ;;  %v4512_v44 = vld [vmem:[#allocation12 + $0xc4] ss:$8 sps:$4 sm:$0xff]  }
  0xc5   : > { %1165 = vmatpush1.bf16.msra.mxu1 %v4469_v15  ;;  %801 = vmatprep.subr.bf16.mxu0 %v4470_v16  ;;  %v4511_v43 = vld [vmem:[#allocation14 + $0xd0] ss:$8 sps:$4 sm:$0xff]   ;;  %v4514_v45 = vld [vmem:[#allocation14 + $0xc4] ss:$8 sps:$4 sm:$0xff]   ;;  %v4516_v50 = vld [vmem:[#allocation12 + $0xc0] ss:$8 sps:$4 sm:$0xff]  }
  0xc6   : > { %1166 = vmatprep.subr.bf16.mxu1 %v4472_v17  ;;  %v542_v46 = vld [vmem:[%s5336_s15 + $0x8] sm:$0xff]  ;;  %v544_v47 = vld [vmem:[%s5336_s15 + $0x18] sm:$0xff]  ;;  %v541_v6 = vld [vmem:[%s5336_s15] sm:$0xff]  ;;  %s5585_s5 = scalar_lea.vmem [#allocation18], %s5332_s20  ;;  %s5587_s14 = smov 0  }
  0xc7   : > { %v907_v48 = vld [vmem:[%s5344_s27 + $0x8] sm:$0xff]  ;;  %v909_v49 = vld [vmem:[%s5344_s27 + $0x18] sm:$0xff]  ;;  %v574_v53 = vpack.c.bf16 %v544_v47, %v542_v46  ;;  %v543_v7 = vld [vmem:[%s5336_s15 + $0x10] sm:$0xff] }
  0xc8   : > { %802 = vmatpush1.bf16.msra.mxu0 %v4474_v18  ;;  %v4517_v51 = vld [vmem:[#allocation14 + $0xc0] ss:$8 sps:$4 sm:$0xff]   ;;  %v4518_v52 = vld [vmem:[#allocation12 + $0xb4] ss:$8 sps:$4 sm:$0xff]   ;;  %v939_v54 = vpack.c.bf16 %v909_v49, %v907_v48  ;;  %v4522_v56 = vld [vmem:[#allocation12 + $0xb0] ss:$8 sps:$4 sm:$0xff]   ;;  %v573_v13 = vpack.c.bf16 %v543_v7, %v541_v6 }
  0xc9   : > { %1167 = vmatpush1.bf16.msra.mxu1 %v4475_v19  ;;  %803 = vmatprep.subr.bf16.mxu0 %v4476_v20  ;;  %v4520_v55 = vld [vmem:[#allocation14 + $0xb4] ss:$8 sps:$4 sm:$0xff]   ;;  %v4523_v57 = vld [vmem:[#allocation14 + $0xb0] ss:$8 sps:$4 sm:$0xff]   ;;  %v4524_v58 = vld [vmem:[#allocation12 + $0xa4] ss:$8 sps:$4 sm:$0xff]  }
  0xca   : > { %1168 = vmatprep.subr.bf16.mxu1 %v4478_v21  ;;  %825 = vmatprep.mubr.bf16.mxu0 %v574_v53  ;;  %v4526_v59 = vld [vmem:[#allocation14 + $0xa4] ss:$8 sps:$4 sm:$0xff]   ;;  %v4528_v60 = vld [vmem:[#allocation12 + $0xa0] ss:$8 sps:$4 sm:$0xff]   ;;  %v4530_v62 = vld [vmem:[#allocation12 + $0x94] ss:$8 sps:$4 sm:$0xff]  }
  0xcb   : > { %1190 = vmatprep.mubr.bf16.mxu1 %v939_v54  ;;  %v4529_v61 = vld [vmem:[#allocation14 + $0xa0] ss:$8 sps:$4 sm:$0xff]   ;;  %v4532_v63 = vld [vmem:[#allocation14 + $0x94] ss:$8 sps:$4 sm:$0xff]   ;;  %v4534_v0 = vld [vmem:[#allocation12 + $0x90] ss:$8 sps:$4 sm:$0xff]  }
  0xcc   : > { %804 = vmatpush1.bf16.msra.mxu0 %v4480_v22  ;;  %v4535_v1 = vld [vmem:[#allocation14 + $0x90] ss:$8 sps:$4 sm:$0xff]   ;;  %v4536_v2 = vld [vmem:[#allocation12 + $0x84] ss:$8 sps:$4 sm:$0xff]   ;;  %v4540_v4 = vld [vmem:[#allocation12 + $0x80] ss:$8 sps:$4 sm:$0xff]  }
  0xcd   : > { %1169 = vmatpush1.bf16.msra.mxu1 %v4481_v23  ;;  %805 = vmatprep.subr.bf16.mxu0 %v4482_v24  ;;  %v4538_v3 = vld [vmem:[#allocation14 + $0x84] ss:$8 sps:$4 sm:$0xff]   ;;  %v4541_v5 = vld [vmem:[#allocation14 + $0x80] ss:$8 sps:$4 sm:$0xff]   ;;  %v908_v9 = vld [vmem:[%s5344_s27 + $0x10] sm:$0xff] }
  0xce   : > { %1170 = vmatprep.subr.bf16.mxu1 %v4484_v25  ;;  %v906_v8 = vld [vmem:[%s5344_s27] sm:$0xff]  ;;  %v4544_v10 = vld [vmem:[#allocation15 + $0x74] ss:$8 sps:$4 sm:$0xff]   ;;  %v546_v11 = vld [vmem:[%s5336_s15 + $0x28] sm:$0xff] }
  0xcf   : > { %v548_v12 = vld [vmem:[%s5336_s15 + $0x38] sm:$0xff]  ;;  %v938_v14 = vpack.c.bf16 %v908_v9, %v906_v8  ;;  %v911_v15 = vld [vmem:[%s5344_s27 + $0x28] sm:$0xff]  ;;  %v545_v22 = vld [vmem:[%s5336_s15 + $0x20] sm:$0xff] }
  0xd0   : > { %806 = vmatpush1.bf16.msra.mxu0 %v4486_v26  ;;  %v913_v16 = vld [vmem:[%s5344_s27 + $0x38] sm:$0xff]  ;;  %v4547_v18 = vld [vmem:[#allocation15 + $0x64] ss:$8 sps:$4 sm:$0xff]   ;;  %v4545_v19 = vld [vmem:[#allocation15 + $0x60] ss:$8 sps:$4 sm:$0xff]   ;;  %v576_v20 = vpack.c.bf16 %v548_v12, %v546_v11 }
  0xd1   : > { %1171 = vmatpush1.bf16.msra.mxu1 %v4487_v27  ;;  %807 = vmatprep.subr.bf16.mxu0 %v4488_v28  ;;  %v4542_v17 = vld [vmem:[#allocation15 + $0x70] ss:$8 sps:$4 sm:$0xff]   ;;  %v941_v21 = vpack.c.bf16 %v913_v16, %v911_v15  ;;  %v910_v24 = vld [vmem:[%s5344_s27 + $0x20] sm:$0xff]  ;;  %v4550_v26 = vld [vmem:[#allocation15 + $0x54] ss:$8 sps:$4 sm:$0xff]  }
  0xd2   : > { %1172 = vmatprep.subr.bf16.mxu1 %v4490_v29  ;;  %v547_v23 = vld [vmem:[%s5336_s15 + $0x30] sm:$0xff]  ;;  %v550_v27 = vld [vmem:[%s5336_s15 + $0x48] sm:$0xff]  ;;  %v921_v48 = vld [vmem:[%s5344_s27 + $0x78] sm:$0xff] }
  0xd3   : > { %v912_v25 = vld [vmem:[%s5344_s27 + $0x30] sm:$0xff]  ;;  %v575_v28 = vpack.c.bf16 %v547_v23, %v545_v22  ;;  %v919_v47 = vld [vmem:[%s5344_s27 + $0x68] sm:$0xff]  ;;  %v553_v54 = vld [vmem:[%s5336_s15 + $0x60] sm:$0xff] }
  0xd4   : > { %808 = vmatpush1.bf16.msra.mxu0 %v4492_v30  ;;  %v940_v29 = vpack.c.bf16 %v912_v25, %v910_v24  ;;  %v552_v30 = vld [vmem:[%s5336_s15 + $0x58] sm:$0xff]  ;;  %v945_v53 = vpack.c.bf16 %v921_v48, %v919_v47  ;;  %v557_v6 = vld [vmem:[%s5336_s15 + $0x80] sm:$0xff]  ;;  %v559_v7 = vld [vmem:[%s5336_s15 + $0x90] sm:$0xff] }
  0xd5   : > { %1173 = vmatpush1.bf16.msra.mxu1 %v4493_v31  ;;  %809 = vmatprep.subr.bf16.mxu0 %v4494_v32  ;;  %v915_v31 = vld [vmem:[%s5344_s27 + $0x48] sm:$0xff]  ;;  %v917_v32 = vld [vmem:[%s5344_s27 + $0x58] sm:$0xff]  ;;  %v922_v8 = vld [vmem:[%s5344_s27 + $0x80] sm:$0xff]  ;;  %v581_v12 = vpack.c.bf16 %v559_v7, %v557_v6 }
  0xd6   : > { %1174 = vmatprep.subr.bf16.mxu1 %v4496_v33  ;;  %v4548_v33 = vld [vmem:[#allocation15 + $0x50] ss:$8 sps:$4 sm:$0xff]   ;;  %v562_v11 = vld [vmem:[%s5336_s15 + $0xa8] sm:$0xff]  ;;  %v561_v22 = vld [vmem:[%s5336_s15 + $0xa0] sm:$0xff] }
  0xd7   : > { %v4554_v49 = vld [vmem:[#allocation15 + $0x30] ss:$8 sps:$4 sm:$0xff]   ;;  %v927_v15 = vld [vmem:[%s5344_s27 + $0xa8] sm:$0xff]  ;;  %v926_v24 = vld [vmem:[%s5344_s27 + $0xa0] sm:$0xff] }
  0xd8   : > { %810 = vmatpush2.bf16.msra.mxu0 %v4498_v34  ;;  %v4553_v34 = vld [vmem:[#allocation15 + $0x44] ss:$8 sps:$4 sm:$0xff]   ;;  %v924_v9 = vld [vmem:[%s5344_s27 + $0x90] sm:$0xff]  ;;  %v929_v16 = vld [vmem:[%s5344_s27 + $0xb8] sm:$0xff] }
  0xd9   : > { %1175 = vmatpush2.bf16.msra.mxu1 %v4499_v35  ;;  %811 = vmatprep.subr.bf16.mxu0 %v4500_v36  ;;  %v578_v35 = vpack.c.bf16 %v552_v30, %v550_v27  ;;  %v943_v36 = vpack.c.bf16 %v917_v32, %v915_v31  ;;  %v563_v23 = vld [vmem:[%s5336_s15 + $0xb0] sm:$0xff]  ;;  %v566_v27 = vld [vmem:[%s5336_s15 + $0xc8] sm:$0xff]  ;;  %v568_v30 = vld [vmem:[%s5336_s15 + $0xd8] sm:$0xff] }
  0xda   : > { %1176 = vmatprep.subr.bf16.mxu1 %v4502_v37  ;;  %v4551_v37 = vld [vmem:[#allocation15 + $0x40] ss:$8 sps:$4 sm:$0xff]   ;;  %v928_v25 = vld [vmem:[%s5344_s27 + $0xb0] sm:$0xff]  ;;  %v933_v32 = vld [vmem:[%s5344_s27 + $0xd8] sm:$0xff] }
  0xdb   : > { %v931_v31 = vld [vmem:[%s5344_s27 + $0xc8] sm:$0xff]  ;;  %v937_v48 = vld [vmem:[%s5344_s27 + $0xf8] sm:$0xff]  ;;  %v1271_v6 = vld [vmem:[%s5351_s22] sm:$0xff] }
  0xdc   : > { %812 = vmatpush2.bf16.msra.mxu0 %v4504_v38  ;;  %v549_v38 = vld [vmem:[%s5336_s15 + $0x40] sm:$0xff]  ;;  %v935_v47 = vld [vmem:[%s5344_s27 + $0xe8] sm:$0xff]  ;;  %v1273_v7 = vld [vmem:[%s5351_s22 + $0x10] sm:$0xff] }
  0xdd   : > { %1177 = vmatpush2.bf16.msra.mxu1 %v4505_v39  ;;  %813 = vmatprep.subr.bf16.mxu0 %v4506_v40  ;;  %v551_v39 = vld [vmem:[%s5336_s15 + $0x50] sm:$0xff]  ;;  %v914_v40 = vld [vmem:[%s5344_s27 + $0x40] sm:$0xff] }
  0xde   : > { %1178 = vmatprep.subr.bf16.mxu1 %v4508_v41  ;;  %v916_v41 = vld [vmem:[%s5344_s27 + $0x50] sm:$0xff] }
  0xdf   : > { %v942_v46 = vpack.c.bf16 %v916_v41, %v914_v40  ;;  %v930_v40 = vld [vmem:[%s5344_s27 + $0xc0] sm:$0xff]  ;;  %v932_v41 = vld [vmem:[%s5344_s27 + $0xd0] sm:$0xff] }
  0xe0   : > { %814 = vmatpush2.bf16.msra.mxu0 %v4510_v42  ;;  %v4556_v42 = vld [vmem:[#allocation15 + $0x34] ss:$8 sps:$4 sm:$0xff]  }
  0xe1   : > { %1179 = vmatpush2.bf16.msra.mxu1 %v4511_v43  ;;  %815 = vmatprep.subr.bf16.mxu0 %v4512_v44  ;;  %v554_v43 = vld [vmem:[%s5336_s15 + $0x68] sm:$0xff]  ;;  %v556_v44 = vld [vmem:[%s5336_s15 + $0x78] sm:$0xff] }
  0xe2   : > { %1180 = vmatprep.subr.bf16.mxu1 %v4514_v45  ;;  %v577_v45 = vpack.c.bf16 %v551_v39, %v549_v38  ;;  %v565_v38 = vld [vmem:[%s5336_s15 + $0xc0] sm:$0xff]  ;;  %v567_v39 = vld [vmem:[%s5336_s15 + $0xd0] sm:$0xff] }
  0xe4   : > { %816 = vmatpush2.bf16.msra.mxu0 %v4516_v50  ;;  %v4559_v50 = vld [vmem:[#allocation15 + $0x24] ss:$8 sps:$4 sm:$0xff]  }
  0xe5   : > { %1181 = vmatpush2.bf16.msra.mxu1 %v4517_v51  ;;  %817 = vmatprep.subr.bf16.mxu0 %v4518_v52  ;;  %v4557_v51 = vld [vmem:[#allocation15 + $0x20] ss:$8 sps:$4 sm:$0xff]   ;;  %v580_v52 = vpack.c.bf16 %v556_v44, %v554_v43  ;;  %v585_v44 = vpack.c.bf16 %v567_v39, %v565_v38 }
  0xe6   : > { %1182 = vmatprep.subr.bf16.mxu1 %v4520_v55  ;;  %v555_v55 = vld [vmem:[%s5336_s15 + $0x70] sm:$0xff]  ;;  %v570_v43 = vld [vmem:[%s5336_s15 + $0xe8] sm:$0xff] }
  0xe8   : > { %818 = vmatpush2.bf16.msra.mxu0 %v4522_v56  ;;  %v918_v56 = vld [vmem:[%s5344_s27 + $0x60] sm:$0xff] }
  0xe9   : > { %1183 = vmatpush2.bf16.msra.mxu1 %v4523_v57  ;;  %819 = vmatprep.subr.bf16.mxu0 %v4524_v58  ;;  %v920_v57 = vld [vmem:[%s5344_s27 + $0x70] sm:$0xff] }
  0xea   : > { %1184 = vmatprep.subr.bf16.mxu1 %v4526_v59  ;;  %v4562_v58 = vld [vmem:[#allocation15 + $0x14] ss:$8 sps:$4 sm:$0xff]   ;;  %v558_v59 = vld [vmem:[%s5336_s15 + $0x88] sm:$0xff] }
  0xec   : > { %820 = vmatpush2.bf16.msra.mxu0 %v4528_v60  ;;  %v579_v60 = vpack.c.bf16 %v555_v55, %v553_v54  ;;  %v569_v54 = vld [vmem:[%s5336_s15 + $0xe0] sm:$0xff]  ;;  %v571_v55 = vld [vmem:[%s5336_s15 + $0xf0] sm:$0xff] }
  0xed   : > { %1185 = vmatpush2.bf16.msra.mxu1 %v4529_v61  ;;  %821 = vmatprep.subr.bf16.mxu0 %v4530_v62  ;;  %v944_v61 = vpack.c.bf16 %v920_v57, %v918_v56  ;;  %v560_v62 = vld [vmem:[%s5336_s15 + $0x98] sm:$0xff]  ;;  %v934_v56 = vld [vmem:[%s5344_s27 + $0xe0] sm:$0xff]  ;;  %v936_v57 = vld [vmem:[%s5344_s27 + $0xf0] sm:$0xff] }
  0xee   : > { %1186 = vmatprep.subr.bf16.mxu1 %v4532_v63  ;;  %v923_v63 = vld [vmem:[%s5344_s27 + $0x88] sm:$0xff] }
  0xf0   : > { %822 = vmatpush2.bf16.msra.mxu0 %v4534_v0  ;;  %v925_v0 = vld [vmem:[%s5344_s27 + $0x98] sm:$0xff] }
  0xf1   : > { %1187 = vmatpush2.bf16.msra.mxu1 %v4535_v1  ;;  %823 = vmatprep.subr.bf16.mxu0 %v4536_v2  ;;  %v4560_v1 = vld [vmem:[#allocation15 + $0x10] ss:$8 sps:$4 sm:$0xff]   ;;  %v4565_v2 = vld [vmem:[#allocation15 + $0x4] ss:$8 sps:$4 sm:$0xff]  }
  0xf2   : > { %1188 = vmatprep.subr.bf16.mxu1 %v4538_v3  ;;  %v582_v3 = vpack.c.bf16 %v560_v62, %v558_v59  ;;  %v1272_v59 = vld [vmem:[%s5351_s22 + $0x8] sm:$0xff]  ;;  %v1274_v62 = vld [vmem:[%s5351_s22 + $0x18] sm:$0xff] }
  0xf4   : > { %824 = vmatpush2.bf16.msra.mxu0 %v4540_v4  ;;  %v947_v4 = vpack.c.bf16 %v925_v0, %v923_v63  ;;  %v1288_v63 = vld [vmem:[%s5351_s22 + $0x88] sm:$0xff]  ;;  %v1290_v0 = vld [vmem:[%s5351_s22 + $0x98] sm:$0xff] }
  0xf5   : > { %1189 = vmatpush2.bf16.msra.mxu1 %v4541_v5  ;;  %1523 = vmatprep.subr.bf16.mxu0 %v4544_v10  ;;  %v4563_v5 = vld [vmem:[#allocation15] ss:$8 sps:$4 sm:$0xff]  }
  0xf6   : > { %4271 = vmatprep.subr.bf16.mxu1 %v4544_v10  ;;  %v4568_v10 = vld [vmem:[#allocation15 + $0xf4] ss:$8 sps:$4 sm:$0xff]  }
  0xf7   : > { %826 = vmatmul.mubr.bf16.vlgmr.msra.gmra.mxu0 %v573_v13  ;;  %v946_v13 = vpack.c.bf16 %v924_v9, %v922_v8  ;;  %v1287_v8 = vld [vmem:[%s5351_s22 + $0x80] sm:$0xff]  ;;  %v1289_v9 = vld [vmem:[%s5351_s22 + $0x90] sm:$0xff] }
  0xf8   : > { %1191 = vmatmul.mubr.bf16.vlgmr.msra.gmra.mxu1 %v938_v14  ;;  %1524 = vmatpush1.bf16.msra.mxu0 %v4542_v17  ;;  %v564_v14 = vld [vmem:[%s5336_s15 + $0xb8] sm:$0xff] }
  0xf9   : > { %4287 = vmatpush1.bf16.msra.mxu1 %v4542_v17  ;;  %1525 = vmatprep.subr.bf16.mxu0 %v4547_v18  ;;  %v4566_v17 = vld [vmem:[#allocation15 + $0xf0] ss:$8 sps:$4 sm:$0xff]  }
  0xfa   : > { %4272 = vmatprep.subr.bf16.mxu1 %v4547_v18  ;;  %835 = vmatprep.mubr.bf16.mxu0 %v576_v20  ;;  %v4571_v18 = vld [vmem:[#allocation15 + $0xe4] ss:$8 sps:$4 sm:$0xff]   ;;  %v949_v20 = vpack.c.bf16 %v929_v16, %v927_v15  ;;  %v1311_v15 = vpack.c.bf16 %v1289_v9, %v1287_v8 }
  0xfb   : > { %1200 = vmatprep.mubr.bf16.mxu1 %v941_v21  ;;  %v4569_v21 = vld [vmem:[#allocation15 + $0xe0] ss:$8 sps:$4 sm:$0xff]  }
  0xfc   : > { %1526 = vmatpush1.bf16.msra.mxu0 %v4545_v19 }
  0xfd   : > { %4288 = vmatpush1.bf16.msra.mxu1 %v4545_v19  ;;  %1527 = vmatprep.subr.bf16.mxu0 %v4550_v26  ;;  %v584_v19 = vpack.c.bf16 %v564_v14, %v562_v11  ;;  %v1278_v11 = vld [vmem:[%s5351_s22 + $0x38] sm:$0xff]  ;;  %v1303_v14 = vpack.c.bf16 %v1273_v7, %v1271_v6 }
  0xfe   : > { %4273 = vmatprep.subr.bf16.mxu1 %v4550_v26  ;;  %v4574_v26 = vld [vmem:[#allocation15 + $0xd4] ss:$8 sps:$4 sm:$0xff]  }
  0xff   : > { %836 = vmatmul.mubr.bf16.gmra.mxu0 %v575_v28  ;;  %v583_v28 = vpack.c.bf16 %v563_v23, %v561_v22  ;;  %v1280_v22 = vld [vmem:[%s5351_s22 + $0x48] sm:$0xff]  ;;  %v1282_v23 = vld [vmem:[%s5351_s22 + $0x58] sm:$0xff] }
 0x100   : > { %1201 = vmatmul.mubr.bf16.gmra.mxu1 %v940_v29  ;;  %1528 = vmatpush1.bf16.msra.mxu0 %v4548_v33  ;;  %v948_v29 = vpack.c.bf16 %v928_v25, %v926_v24  ;;  %v1296_v24 = vld [vmem:[%s5351_s22 + $0xc8] sm:$0xff]  ;;  %v1298_v25 = vld [vmem:[%s5351_s22 + $0xd8] sm:$0xff] }
 0x101   : > { %4289 = vmatpush1.bf16.msra.mxu1 %v4548_v33  ;;  %1529 = vmatprep.subr.bf16.mxu0 %v4553_v34  ;;  %v4572_v33 = vld [vmem:[#allocation15 + $0xd0] ss:$8 sps:$4 sm:$0xff]  }
 0x102   : > { %4274 = vmatprep.subr.bf16.mxu1 %v4553_v34  ;;  %845 = vmatprep.mubr.bf16.mxu0 %v578_v35  ;;  %v4577_v34 = vld [vmem:[#allocation15 + $0xc4] ss:$8 sps:$4 sm:$0xff]   ;;  %v586_v35 = vpack.c.bf16 %v568_v30, %v566_v27 }
 0x103   : > { %1210 = vmatprep.mubr.bf16.mxu1 %v943_v36  ;;  %v951_v36 = vpack.c.bf16 %v933_v32, %v931_v31  ;;  %v1279_v30 = vld [vmem:[%s5351_s22 + $0x40] sm:$0xff]  ;;  %v1281_v31 = vld [vmem:[%s5351_s22 + $0x50] sm:$0xff] }
 0x104   : > { %1530 = vmatpush1.bf16.msra.mxu0 %v4551_v37  ;;  %v1295_v32 = vld [vmem:[%s5351_s22 + $0xc0] sm:$0xff]  ;;  %v1307_v38 = vpack.c.bf16 %v1281_v31, %v1279_v30 }
 0x105   : > { %4290 = vmatpush1.bf16.msra.mxu1 %v4551_v37  ;;  %1531 = vmatprep.subr.bf16.mxu0 %v4556_v42  ;;  %v4575_v37 = vld [vmem:[#allocation15 + $0xc0] ss:$8 sps:$4 sm:$0xff]  }
 0x106   : > { %4275 = vmatprep.subr.bf16.mxu1 %v4556_v42  ;;  %v4580_v42 = vld [vmem:[#allocation15 + $0xb4] ss:$8 sps:$4 sm:$0xff]  }
 0x107   : > { %846 = vmatmul.mubr.bf16.gmra.mxu0 %v577_v45  ;;  %v950_v45 = vpack.c.bf16 %v932_v41, %v930_v40 }
 0x108   : > { %1211 = vmatmul.mubr.bf16.gmra.mxu1 %v942_v46  ;;  %1532 = vmatpush1.bf16.msra.mxu0 %v4554_v49  ;;  %v572_v46 = vld [vmem:[%s5336_s15 + $0xf8] sm:$0xff] }
 0x109   : > { %4291 = vmatpush1.bf16.msra.mxu1 %v4554_v49  ;;  %1533 = vmatprep.subr.bf16.mxu0 %v4559_v50  ;;  %v4578_v49 = vld [vmem:[#allocation15 + $0xb0] ss:$8 sps:$4 sm:$0xff]  }
 0x10a   : > { %4276 = vmatprep.subr.bf16.mxu1 %v4559_v50  ;;  %855 = vmatprep.mubr.bf16.mxu0 %v580_v52  ;;  %v4583_v50 = vld [vmem:[#allocation15 + $0xa4] ss:$8 sps:$4 sm:$0xff]   ;;  %v953_v52 = vpack.c.bf16 %v937_v48, %v935_v47  ;;  %v623_v48 = vlaneseq }
 0x10b   : > { %1220 = vmatprep.mubr.bf16.mxu1 %v945_v53  ;;  %v4581_v53 = vld [vmem:[#allocation15 + $0xa0] ss:$8 sps:$4 sm:$0xff]  }
 0x10c   : > { %1534 = vmatpush1.bf16.msra.mxu0 %v4557_v51 }
 0x10d   : > { %4292 = vmatpush1.bf16.msra.mxu1 %v4557_v51  ;;  %1535 = vmatprep.subr.bf16.mxu0 %v4562_v58  ;;  %v588_v51 = vpack.c.bf16 %v572_v46, %v570_v43  ;;  %v1285_v43 = vld [vmem:[%s5351_s22 + $0x70] sm:$0xff] }
 0x10e   : > { %4277 = vmatprep.subr.bf16.mxu1 %v4562_v58  ;;  %v4586_v58 = vld [vmem:[#allocation15 + $0x94] ss:$8 sps:$4 sm:$0xff]  }
 0x10f   : > { %856 = vmatmul.mubr.bf16.gmra.mxu0 %v579_v60  ;;  %v587_v60 = vpack.c.bf16 %v571_v55, %v569_v54 }
 0x110   : > { %1221 = vmatmul.mubr.bf16.gmra.mxu1 %v944_v61  ;;  %1536 = vmatpush1.bf16.msra.mxu0 %v4560_v1  ;;  %v952_v61 = vpack.c.bf16 %v936_v57, %v934_v56 }
 0x111   : > { %4293 = vmatpush1.bf16.msra.mxu1 %v4560_v1  ;;  %1537 = vmatprep.subr.bf16.mxu0 %v4565_v2  ;;  %v4584_v1 = vld [vmem:[#allocation15 + $0x90] ss:$8 sps:$4 sm:$0xff]  }
 0x112   : > { %4278 = vmatprep.subr.bf16.mxu1 %v4565_v2  ;;  %865 = vmatprep.mubr.bf16.mxu0 %v582_v3  ;;  %v4589_v2 = vld [vmem:[#allocation15 + $0x84] ss:$8 sps:$4 sm:$0xff]   ;;  %v1304_v3 = vpack.c.bf16 %v1274_v62, %v1272_v59 }
 0x113   : > { %1230 = vmatprep.mubr.bf16.mxu1 %v947_v4  ;;  %v1312_v4 = vpack.c.bf16 %v1290_v0, %v1288_v63 }
 0x114   : > { %1538 = vmatpush1.bf16.msra.mxu0 %v4563_v5 }
 0x115   : > { %4294 = vmatpush1.bf16.msra.mxu1 %v4563_v5  ;;  %1539 = vmatprep.subr.bf16.mxu0 %v4568_v10  ;;  %v4587_v5 = vld [vmem:[#allocation15 + $0x80] ss:$8 sps:$4 sm:$0xff]  }
 0x116   : > { %4279 = vmatprep.subr.bf16.mxu1 %v4568_v10  ;;  %v1276_v10 = vld [vmem:[%s5351_s22 + $0x28] sm:$0xff] }
 0x117   : > { %866 = vmatmul.mubr.bf16.gmra.mxu0 %v581_v12  ;;  %v1292_v12 = vld [vmem:[%s5351_s22 + $0xa8] sm:$0xff]  ;;  %v1306_v16 = vpack.c.bf16 %v1278_v11, %v1276_v10 }
 0x118   : > { %1231 = vmatmul.mubr.bf16.gmra.mxu1 %v946_v13  ;;  %1540 = vmatpush2.bf16.msra.mxu0 %v4566_v17  ;;  %v1294_v13 = vld [vmem:[%s5351_s22 + $0xb8] sm:$0xff] }
 0x119   : > { %4295 = vmatpush2.bf16.msra.mxu1 %v4566_v17  ;;  %1541 = vmatprep.subr.bf16.mxu0 %v4571_v18  ;;  %v1314_v17 = vpack.c.bf16 %v1294_v13, %v1292_v12 }
 0x11a   : > { %4280 = vmatprep.subr.bf16.mxu1 %v4571_v18  ;;  %875 = vmatprep.mubr.bf16.mxu0 %v584_v19  ;;  %v1275_v18 = vld [vmem:[%s5351_s22 + $0x20] sm:$0xff]  ;;  %v1277_v19 = vld [vmem:[%s5351_s22 + $0x30] sm:$0xff] }
 0x11b   : > { %1240 = vmatprep.mubr.bf16.mxu1 %v949_v20  ;;  %v1291_v20 = vld [vmem:[%s5351_s22 + $0xa0] sm:$0xff] }
 0x11c   : > { %1542 = vmatpush2.bf16.msra.mxu0 %v4569_v21 }
 0x11d   : > { %4296 = vmatpush2.bf16.msra.mxu1 %v4569_v21  ;;  %1543 = vmatprep.subr.bf16.mxu0 %v4574_v26  ;;  %v1293_v21 = vld [vmem:[%s5351_s22 + $0xb0] sm:$0xff] }
 0x11e   : > { %4281 = vmatprep.subr.bf16.mxu1 %v4574_v26  ;;  %v1305_v26 = vpack.c.bf16 %v1277_v19, %v1275_v18  ;;  %v1313_v27 = vpack.c.bf16 %v1293_v21, %v1291_v20 }
 0x11f   : > { %876 = vmatmul.mubr.bf16.gmra.mxu0 %v583_v28  ;;  %v1308_v28 = vpack.c.bf16 %v1282_v23, %v1280_v22 }
 0x120   : > { %1241 = vmatmul.mubr.bf16.gmra.mxu1 %v948_v29  ;;  %1544 = vmatpush2.bf16.msra.mxu0 %v4572_v33  ;;  %v1316_v29 = vpack.c.bf16 %v1298_v25, %v1296_v24 }
 0x121   : > { %4297 = vmatpush2.bf16.msra.mxu1 %v4572_v33  ;;  %1545 = vmatprep.subr.bf16.mxu0 %v4577_v34  ;;  %v1297_v33 = vld [vmem:[%s5351_s22 + $0xd0] sm:$0xff] }
 0x122   : > { %4282 = vmatprep.subr.bf16.mxu1 %v4577_v34  ;;  %885 = vmatprep.mubr.bf16.mxu0 %v586_v35  ;;  %v1284_v34 = vld [vmem:[%s5351_s22 + $0x68] sm:$0xff]  ;;  %v1286_v35 = vld [vmem:[%s5351_s22 + $0x78] sm:$0xff]  ;;  %v1315_v39 = vpack.c.bf16 %v1297_v33, %v1295_v32 }
 0x123   : > { %1250 = vmatprep.mubr.bf16.mxu1 %v951_v36  ;;  %v1300_v36 = vld [vmem:[%s5351_s22 + $0xe8] sm:$0xff]  ;;  %v1310_v40 = vpack.c.bf16 %v1286_v35, %v1284_v34 }
 0x124   : > { %1546 = vmatpush2.bf16.msra.mxu0 %v4575_v37 }
 0x125   : > { %4298 = vmatpush2.bf16.msra.mxu1 %v4575_v37  ;;  %1547 = vmatprep.subr.bf16.mxu0 %v4580_v42  ;;  %v1302_v37 = vld [vmem:[%s5351_s22 + $0xf8] sm:$0xff] }
 0x126   : > { %4283 = vmatprep.subr.bf16.mxu1 %v4580_v42  ;;  %v1318_v41 = vpack.c.bf16 %v1302_v37, %v1300_v36  ;;  %v1283_v42 = vld [vmem:[%s5351_s22 + $0x60] sm:$0xff] }
 0x127   : > { %886 = vmatmul.mubr.bf16.gmra.mxu0 %v585_v44  ;;  %v1299_v44 = vld [vmem:[%s5351_s22 + $0xe0] sm:$0xff]  ;;  %v1309_v46 = vpack.c.bf16 %v1285_v43, %v1283_v42 }
 0x128   : > { %1251 = vmatmul.mubr.bf16.gmra.mxu1 %v950_v45  ;;  %1548 = vmatpush2.bf16.msra.mxu0 %v4578_v49  ;;  %v1301_v45 = vld [vmem:[%s5351_s22 + $0xf0] sm:$0xff] }
 0x129   : > { %4299 = vmatpush2.bf16.msra.mxu1 %v4578_v49  ;;  %1549 = vmatprep.subr.bf16.mxu0 %v4583_v50  ;;  %v1317_v47 = vpack.c.bf16 %v1301_v45, %v1299_v44  ;;  %v624_v49 = vshrl.u32 %v623_v48, 7 }
 0x12a   : > { %4284 = vmatprep.subr.bf16.mxu1 %v4583_v50  ;;  %895 = vmatprep.mubr.bf16.mxu0 %v588_v51  ;;  %v621_v51 = vld [vmem:[%s5802_s7] sm:$0x3] }
 0x12b   : > { %1260 = vmatprep.mubr.bf16.mxu1 %v953_v52  ;;  %v5457_v50 = vsub.s32 0, %v624_v49  ;;  %v986_v52 = vld [vmem:[%s5803_s8] sm:$0x3] }
 0x12c   : > { %1550 = vmatpush2.bf16.msra.mxu0 %v4581_v53 }
 0x12d   : > { %4300 = vmatpush2.bf16.msra.mxu1 %v4581_v53  ;;  %1551 = vmatprep.subr.bf16.mxu0 %v4586_v58  ;;  %v5465_v53 = vsub.s32 1, %v624_v49  ;;  %v5468_v56 = vrot.slane %v621_v51, %v5457_v50  ;;  %v5471_v57 = vrot.slane %v986_v52, %v5457_v50 }
 0x12e   : > { %4285 = vmatprep.subr.bf16.mxu1 %v4586_v58 }
 0x12f   : > { %896 = vmatmul.mubr.bf16.gmra.mxu0 %v587_v60  ;;  %v5474_v58 = vrot.slane %v621_v51, %v5465_v53  ;;  %v5477_v60 = vrot.slane %v986_v52, %v5465_v53 }
 0x130   : > { %1261 = vmatmul.mubr.bf16.gmra.mxu1 %v952_v61  ;;  %1552 = vmatpush2.bf16.msra.mxu0 %v4584_v1 }
 0x131   : > { %4301 = vmatpush2.bf16.msra.mxu1 %v4584_v1  ;;  %1553 = vmatprep.subr.bf16.mxu0 %v4589_v2 }
 0x132   : > { %4286 = vmatprep.subr.bf16.mxu1 %v4589_v2  ;;  %1555 = vmatprep.mubr.bf16.mxu0 %v1304_v3 }
 0x133   : > { %1595 = vmatprep.mubr.bf16.mxu1 %v1312_v4 }
 0x134   : > { %1554 = vmatpush2.bf16.msra.mxu0 %v4587_v5 }
 0x135   : > { %4302 = vmatpush2.bf16.msra.mxu1 %v4587_v5 }
 0x137   : > { %1556 = vmatmul.mubr.bf16.vlgmr.msra.gmra.mxu0 %v1303_v14 }
 0x138   : > { %1596 = vmatmul.mubr.bf16.vlgmr.msra.gmra.mxu1 %v1311_v15  ;;  %1565 = vmatprep.mubr.bf16.mxu0 %v1306_v16 }
 0x139   : > { %1605 = vmatprep.mubr.bf16.mxu1 %v1314_v17 }
 0x13f   : > { %1566 = vmatmul.mubr.bf16.gmra.mxu0 %v1305_v26 }
 0x140   : > { %1606 = vmatmul.mubr.bf16.gmra.mxu1 %v1313_v27  ;;  %1575 = vmatprep.mubr.bf16.mxu0 %v1308_v28 }
 0x141   : > { %1615 = vmatprep.mubr.bf16.mxu1 %v1316_v29 }
 0x147   : > { %1576 = vmatmul.mubr.bf16.gmra.mxu0 %v1307_v38 }
 0x148   : > { %1616 = vmatmul.mubr.bf16.gmra.mxu1 %v1315_v39  ;;  %1585 = vmatprep.mubr.bf16.mxu0 %v1310_v40 }
 0x149   : > { %1625 = vmatprep.mubr.bf16.mxu1 %v1318_v41 }
 0x14f   : > { %1586 = vmatmul.mubr.bf16.gmra.mxu0 %v1309_v46 }
 0x150   : > { %1626 = vmatmul.mubr.bf16.gmra.mxu1 %v1317_v47 }
 0x1b7   : > { %v827_v54 = vpop.f32.mrf.mxu0 }
 0x1b8   : > { %v1192_v55 = vpop.f32.mrf.mxu1  ;;  %v828_v0 = vadd.f32 %v827_v54, %v5468_v56 }
 0x1b9   : > { %v829_v59 = vpop.f32.mrf.mxu0  ;;  %v1193_v1 = vadd.f32 %v1192_v55, %v5471_v57 }
 0x1ba   : > { %v1194_v61 = vpop.f32.mrf.mxu1  ;;  %v830_v4 = vadd.f32 %v829_v59, %v5474_v58 }
 0x1bb   : > { %v831_v62 = vpop.f32.mrf.mxu0  ;;  %v1195_v5 = vadd.f32 %v1194_v61, %v5477_v60 }
 0x1bc   : > { %v1196_v63 = vpop.f32.mrf.mxu1  ;;  %v832_v2 = vadd.f32 %v831_v62, %v5468_v56 }
 0x1bd   : > { %v1197_v3 = vadd.f32 %v1196_v63, %v5471_v57  ;;  %v833_v6 = vpop.f32.mrf.mxu0 }
 0x1be   : > { %v1198_v7 = vpop.f32.mrf.mxu1  ;;  %v3849_v8 = vpack.c.bf16 %v832_v2, %v828_v0  ;;  %v834_v10 = vadd.f32 %v833_v6, %v5474_v58 }
 0x1bf   : > { %v3889_v9 = vpack.c.bf16 %v1197_v3, %v1193_v1  ;;  %v1199_v11 = vadd.f32 %v1198_v7, %v5477_v60  ;;  %v837_v12 = vpop.f32.mrf.mxu0 }
 0x1c0   : > { %v1202_v13 = vpop.f32.mrf.mxu1  ;;  %3850 = vst [vmem:[#allocation2] sm:$0xff] %v3849_v8   ;;  %v3969_v14 = vpack.c.bf16 %v834_v10, %v830_v4  ;;  %v838_v20 = vadd.f32 %v837_v12, %v5468_v56 }
 0x1c1   : > { %3890 = vst [vmem:[#allocation3] sm:$0xff] %v3889_v9   ;;  %v4009_v15 = vpack.c.bf16 %v1199_v11, %v1195_v5  ;;  %v839_v16 = vpop.f32.mrf.mxu0  ;;  %v1203_v21 = vadd.f32 %v1202_v13, %v5471_v57 }
 0x1c2   : > { %v1204_v17 = vpop.f32.mrf.mxu1  ;;  %3970 = vst [vmem:[#allocation2 + $0x40] sm:$0xff] %v3969_v14   ;;  %v840_v24 = vadd.f32 %v839_v16, %v5474_v58 }
 0x1c3   : > { %4010 = vst [vmem:[#allocation3 + $0x40] sm:$0xff] %v4009_v15   ;;  %v841_v18 = vpop.f32.mrf.mxu0  ;;  %v1205_v25 = vadd.f32 %v1204_v17, %v5477_v60 }
 0x1c4   : > { %v1206_v19 = vpop.f32.mrf.mxu1  ;;  %v842_v22 = vadd.f32 %v841_v18, %v5468_v56 }
 0x1c5   : > { %v1207_v23 = vadd.f32 %v1206_v19, %v5471_v57  ;;  %v843_v26 = vpop.f32.mrf.mxu0 }
 0x1c6   : > { %v1208_v27 = vpop.f32.mrf.mxu1  ;;  %v3854_v28 = vpack.c.bf16 %v842_v22, %v838_v20  ;;  %v844_v30 = vadd.f32 %v843_v26, %v5474_v58 }
 0x1c7   : > { %v3894_v29 = vpack.c.bf16 %v1207_v23, %v1203_v21  ;;  %v1209_v31 = vadd.f32 %v1208_v27, %v5477_v60  ;;  %v847_v32 = vpop.f32.mrf.mxu0 }
 0x1c8   : > { %v1212_v33 = vpop.f32.mrf.mxu1  ;;  %4126 = vst [vmem:[#allocation2 + $0x8] sm:$0xff] %v3854_v28   ;;  %v3974_v34 = vpack.c.bf16 %v844_v30, %v840_v24  ;;  %v848_v40 = vadd.f32 %v847_v32, %v5468_v56 }
 0x1c9   : > { %4133 = vst [vmem:[#allocation3 + $0x8] sm:$0xff] %v3894_v29   ;;  %v4014_v35 = vpack.c.bf16 %v1209_v31, %v1205_v25  ;;  %v849_v36 = vpop.f32.mrf.mxu0  ;;  %v1213_v41 = vadd.f32 %v1212_v33, %v5471_v57 }
 0x1ca   : > { %v1214_v37 = vpop.f32.mrf.mxu1  ;;  %4147 = vst [vmem:[#allocation2 + $0x48] sm:$0xff] %v3974_v34   ;;  %v850_v44 = vadd.f32 %v849_v36, %v5474_v58 }
 0x1cb   : > { %4154 = vst [vmem:[#allocation3 + $0x48] sm:$0xff] %v4014_v35   ;;  %v851_v38 = vpop.f32.mrf.mxu0  ;;  %v1215_v45 = vadd.f32 %v1214_v37, %v5477_v60 }
 0x1cc   : > { %v1216_v39 = vpop.f32.mrf.mxu1  ;;  %v852_v42 = vadd.f32 %v851_v38, %v5468_v56 }
 0x1cd   : > { %v1217_v43 = vadd.f32 %v1216_v39, %v5471_v57  ;;  %v853_v46 = vpop.f32.mrf.mxu0 }
 0x1ce   : > { %v1218_v47 = vpop.f32.mrf.mxu1  ;;  %v3859_v48 = vpack.c.bf16 %v852_v42, %v848_v40  ;;  %v854_v51 = vadd.f32 %v853_v46, %v5474_v58 }
 0x1cf   : > { %v3899_v49 = vpack.c.bf16 %v1217_v43, %v1213_v41  ;;  %v1219_v52 = vadd.f32 %v1218_v47, %v5477_v60  ;;  %v857_v54 = vpop.f32.mrf.mxu0 }
 0x1d0   : > { %v1222_v55 = vpop.f32.mrf.mxu1  ;;  %4127 = vst [vmem:[#allocation2 + $0x10] sm:$0xff] %v3859_v48   ;;  %v3979_v59 = vpack.c.bf16 %v854_v51, %v850_v44  ;;  %v858_v2 = vadd.f32 %v857_v54, %v5468_v56 }
 0x1d1   : > { %4134 = vst [vmem:[#allocation3 + $0x10] sm:$0xff] %v3899_v49   ;;  %v4019_v61 = vpack.c.bf16 %v1219_v52, %v1215_v45  ;;  %v859_v62 = vpop.f32.mrf.mxu0  ;;  %v1223_v3 = vadd.f32 %v1222_v55, %v5471_v57 }
 0x1d2   : > { %v1224_v63 = vpop.f32.mrf.mxu1  ;;  %4148 = vst [vmem:[#allocation2 + $0x50] sm:$0xff] %v3979_v59   ;;  %v860_v6 = vadd.f32 %v859_v62, %v5474_v58 }
 0x1d3   : > { %4155 = vst [vmem:[#allocation3 + $0x50] sm:$0xff] %v4019_v61   ;;  %v861_v0 = vpop.f32.mrf.mxu0  ;;  %v1225_v7 = vadd.f32 %v1224_v63, %v5477_v60 }
 0x1d4   : > { %v1226_v1 = vpop.f32.mrf.mxu1  ;;  %v862_v4 = vadd.f32 %v861_v0, %v5468_v56 }
 0x1d5   : > { %v1227_v5 = vadd.f32 %v1226_v1, %v5471_v57  ;;  %v863_v8 = vpop.f32.mrf.mxu0 }
 0x1d6   : > { %v1228_v9 = vpop.f32.mrf.mxu1  ;;  %v3864_v10 = vpack.c.bf16 %v862_v4, %v858_v2  ;;  %v864_v12 = vadd.f32 %v863_v8, %v5474_v58 }
 0x1d7   : > { %v3904_v11 = vpack.c.bf16 %v1227_v5, %v1223_v3  ;;  %v1229_v13 = vadd.f32 %v1228_v9, %v5477_v60  ;;  %v867_v14 = vpop.f32.mrf.mxu0 }
 0x1d8   : > { %v1232_v15 = vpop.f32.mrf.mxu1  ;;  %4128 = vst [vmem:[#allocation2 + $0x18] sm:$0xff] %v3864_v10   ;;  %v3984_v16 = vpack.c.bf16 %v864_v12, %v860_v6  ;;  %v868_v22 = vadd.f32 %v867_v14, %v5468_v56 }
 0x1d9   : > { %4135 = vst [vmem:[#allocation3 + $0x18] sm:$0xff] %v3904_v11   ;;  %v4024_v17 = vpack.c.bf16 %v1229_v13, %v1225_v7  ;;  %v869_v18 = vpop.f32.mrf.mxu0  ;;  %v1233_v23 = vadd.f32 %v1232_v15, %v5471_v57 }
 0x1da   : > { %v1234_v19 = vpop.f32.mrf.mxu1  ;;  %4149 = vst [vmem:[#allocation2 + $0x58] sm:$0xff] %v3984_v16   ;;  %v870_v26 = vadd.f32 %v869_v18, %v5474_v58 }
 0x1db   : > { %4156 = vst [vmem:[#allocation3 + $0x58] sm:$0xff] %v4024_v17   ;;  %v871_v20 = vpop.f32.mrf.mxu0  ;;  %v1235_v27 = vadd.f32 %v1234_v19, %v5477_v60 }
 0x1dc   : > { %v1236_v21 = vpop.f32.mrf.mxu1  ;;  %v872_v24 = vadd.f32 %v871_v20, %v5468_v56 }
 0x1dd   : > { %v1237_v25 = vadd.f32 %v1236_v21, %v5471_v57  ;;  %v873_v28 = vpop.f32.mrf.mxu0 }
 0x1de   : > { %v1238_v29 = vpop.f32.mrf.mxu1  ;;  %v3869_v30 = vpack.c.bf16 %v872_v24, %v868_v22  ;;  %v874_v32 = vadd.f32 %v873_v28, %v5474_v58 }
 0x1df   : > { %v3909_v31 = vpack.c.bf16 %v1237_v25, %v1233_v23  ;;  %v1239_v33 = vadd.f32 %v1238_v29, %v5477_v60  ;;  %v877_v34 = vpop.f32.mrf.mxu0 }
 0x1e0   : > { %v1242_v35 = vpop.f32.mrf.mxu1  ;;  %4129 = vst [vmem:[#allocation2 + $0x20] sm:$0xff] %v3869_v30   ;;  %v3989_v36 = vpack.c.bf16 %v874_v32, %v870_v26  ;;  %v878_v42 = vadd.f32 %v877_v34, %v5468_v56  ;;  %v1351_v32 = vld [vmem:[%s5804_s9] sm:$0x3] }
 0x1e1   : > { %4136 = vst [vmem:[#allocation3 + $0x20] sm:$0xff] %v3909_v31   ;;  %v4029_v37 = vpack.c.bf16 %v1239_v33, %v1235_v27  ;;  %v879_v38 = vpop.f32.mrf.mxu0  ;;  %v1243_v43 = vadd.f32 %v1242_v35, %v5471_v57 }
 0x1e2   : > { %v1244_v39 = vpop.f32.mrf.mxu1  ;;  %4150 = vst [vmem:[#allocation2 + $0x60] sm:$0xff] %v3989_v36   ;;  %v880_v46 = vadd.f32 %v879_v38, %v5474_v58 }
 0x1e3   : > { %4157 = vst [vmem:[#allocation3 + $0x60] sm:$0xff] %v4029_v37   ;;  %v881_v40 = vpop.f32.mrf.mxu0  ;;  %v1245_v47 = vadd.f32 %v1244_v39, %v5477_v60  ;;  %v5547_v39 = vrot.slane %v1351_v32, %v5457_v50 }
 0x1e4   : > { %v1246_v41 = vpop.f32.mrf.mxu1  ;;  %v882_v44 = vadd.f32 %v881_v40, %v5468_v56  ;;  %v5550_v40 = vrot.slane %v1351_v32, %v5465_v53 }
 0x1e5   : > { %v1247_v45 = vadd.f32 %v1246_v41, %v5471_v57  ;;  %v883_v48 = vpop.f32.mrf.mxu0 }
 0x1e6   : > { %v1248_v49 = vpop.f32.mrf.mxu1  ;;  %v3874_v51 = vpack.c.bf16 %v882_v44, %v878_v42  ;;  %v884_v54 = vadd.f32 %v883_v48, %v5474_v58 }
 0x1e7   : > { %v3914_v52 = vpack.c.bf16 %v1247_v45, %v1243_v43  ;;  %v1249_v55 = vadd.f32 %v1248_v49, %v5477_v60  ;;  %v887_v59 = vpop.f32.mrf.mxu0 }
 0x1e8   : > { %v1252_v61 = vpop.f32.mrf.mxu1  ;;  %4130 = vst [vmem:[#allocation2 + $0x28] sm:$0xff] %v3874_v51   ;;  %v3994_v62 = vpack.c.bf16 %v884_v54, %v880_v46  ;;  %v888_v4 = vadd.f32 %v887_v59, %v5468_v56 }
 0x1e9   : > { %4137 = vst [vmem:[#allocation3 + $0x28] sm:$0xff] %v3914_v52   ;;  %v4034_v63 = vpack.c.bf16 %v1249_v55, %v1245_v47  ;;  %v889_v0 = vpop.f32.mrf.mxu0  ;;  %v1253_v5 = vadd.f32 %v1252_v61, %v5471_v57 }
 0x1ea   : > { %v1254_v1 = vpop.f32.mrf.mxu1  ;;  %4151 = vst [vmem:[#allocation2 + $0x68] sm:$0xff] %v3994_v62   ;;  %v890_v8 = vadd.f32 %v889_v0, %v5474_v58 }
 0x1eb   : > { %4158 = vst [vmem:[#allocation3 + $0x68] sm:$0xff] %v4034_v63   ;;  %v891_v2 = vpop.f32.mrf.mxu0  ;;  %v1255_v9 = vadd.f32 %v1254_v1, %v5477_v60 }
 0x1ec   : > { %v1256_v3 = vpop.f32.mrf.mxu1  ;;  %v892_v6 = vadd.f32 %v891_v2, %v5468_v56 }
 0x1ed   : > { %v1257_v7 = vadd.f32 %v1256_v3, %v5471_v57  ;;  %v893_v10 = vpop.f32.mrf.mxu0 }
 0x1ee   : > { %v1258_v11 = vpop.f32.mrf.mxu1  ;;  %v3879_v12 = vpack.c.bf16 %v892_v6, %v888_v4  ;;  %v894_v14 = vadd.f32 %v893_v10, %v5474_v58 }
 0x1ef   : > { %v3919_v13 = vpack.c.bf16 %v1257_v7, %v1253_v5  ;;  %v1259_v15 = vadd.f32 %v1258_v11, %v5477_v60  ;;  %v897_v16 = vpop.f32.mrf.mxu0 }
 0x1f0   : > { %v1262_v17 = vpop.f32.mrf.mxu1  ;;  %4131 = vst [vmem:[#allocation2 + $0x30] sm:$0xff] %v3879_v12   ;;  %v3999_v18 = vpack.c.bf16 %v894_v14, %v890_v8  ;;  %v898_v24 = vadd.f32 %v897_v16, %v5468_v56 }
 0x1f1   : > { %4138 = vst [vmem:[#allocation3 + $0x30] sm:$0xff] %v3919_v13   ;;  %v4039_v19 = vpack.c.bf16 %v1259_v15, %v1255_v9  ;;  %v899_v20 = vpop.f32.mrf.mxu0  ;;  %v1263_v25 = vadd.f32 %v1262_v17, %v5471_v57 }
 0x1f2   : > { %v1264_v21 = vpop.f32.mrf.mxu1  ;;  %4152 = vst [vmem:[#allocation2 + $0x70] sm:$0xff] %v3999_v18   ;;  %v900_v28 = vadd.f32 %v899_v20, %v5474_v58 }
 0x1f3   : > { %4159 = vst [vmem:[#allocation3 + $0x70] sm:$0xff] %v4039_v19   ;;  %v901_v22 = vpop.f32.mrf.mxu0  ;;  %v1265_v29 = vadd.f32 %v1264_v21, %v5477_v60 }
 0x1f4   : > { %v1266_v23 = vpop.f32.mrf.mxu1  ;;  %v902_v26 = vadd.f32 %v901_v22, %v5468_v56 }
 0x1f5   : > { %v1267_v27 = vadd.f32 %v1266_v23, %v5471_v57  ;;  %v903_v30 = vpop.f32.mrf.mxu0 }
 0x1f6   : > { %v1268_v31 = vpop.f32.mrf.mxu1  ;;  %v3884_v33 = vpack.c.bf16 %v902_v26, %v898_v24  ;;  %v904_v35 = vadd.f32 %v903_v30, %v5474_v58 }
 0x1f7   : > { %v3924_v34 = vpack.c.bf16 %v1267_v27, %v1263_v25  ;;  %v1269_v36 = vadd.f32 %v1268_v31, %v5477_v60  ;;  %v1557_v37 = vpop.f32.mrf.mxu0 }
 0x1f8   : > { %v1597_v56 = vpop.f32.mrf.mxu1  ;;  %4132 = vst [vmem:[#allocation2 + $0x38] sm:$0xff] %v3884_v33   ;;  %v4004_v57 = vpack.c.bf16 %v904_v35, %v900_v28  ;;  %v1558_v60 = vadd.f32 %v1557_v37, %v5547_v39 }
 0x1f9   : > { %4139 = vst [vmem:[#allocation3 + $0x38] sm:$0xff] %v3924_v34   ;;  %v4044_v38 = vpack.c.bf16 %v1269_v36, %v1265_v29  ;;  %v1559_v41 = vpop.f32.mrf.mxu0  ;;  %v1598_v44 = vadd.f32 %v1597_v56, %v5547_v39 }
 0x1fa   : > { %v1599_v42 = vpop.f32.mrf.mxu1  ;;  %4153 = vst [vmem:[#allocation2 + $0x78] sm:$0xff] %v4004_v57   ;;  %v1560_v47 = vadd.f32 %v1559_v41, %v5550_v40 }
 0x1fb   : > { %4160 = vst [vmem:[#allocation3 + $0x78] sm:$0xff] %v4044_v38   ;;  %v1561_v43 = vpop.f32.mrf.mxu0  ;;  %v1600_v48 = vadd.f32 %v1599_v42, %v5550_v40 }
 0x1fc   : > { %v1601_v58 = vpop.f32.mrf.mxu1  ;;  %v1562_v45 = vadd.f32 %v1561_v43, %v5547_v39 }
 0x1fd   : > { %v1602_v46 = vadd.f32 %v1601_v58, %v5547_v39  ;;  %v1563_v49 = vpop.f32.mrf.mxu0 }
 0x1fe   : > { %v1603_v51 = vpop.f32.mrf.mxu1  ;;  %v3929_v52 = vpack.c.bf16 %v1562_v45, %v1558_v60  ;;  %v1564_v55 = vadd.f32 %v1563_v49, %v5550_v40 }
 0x1ff   : > { %v3949_v54 = vpack.c.bf16 %v1602_v46, %v1598_v44  ;;  %v1604_v59 = vadd.f32 %v1603_v51, %v5550_v40  ;;  %v1567_v61 = vpop.f32.mrf.mxu0 }
 0x200   : > { %v1607_v62 = vpop.f32.mrf.mxu1  ;;  %3930 = vst [vmem:[#allocation4] sm:$0xff] %v3929_v52   ;;  %v4049_v63 = vpack.c.bf16 %v1564_v55, %v1560_v47  ;;  %v1568_v5 = vadd.f32 %v1567_v61, %v5547_v39 }
 0x201   : > { %4143 = vst [vmem:[#allocation4 + $0x20] sm:$0xff] %v3949_v54   ;;  %v4069_v0 = vpack.c.bf16 %v1604_v59, %v1600_v48  ;;  %v1569_v1 = vpop.f32.mrf.mxu0  ;;  %v1608_v6 = vadd.f32 %v1607_v62, %v5547_v39 }
 0x202   : > { %v1609_v2 = vpop.f32.mrf.mxu1  ;;  %4050 = vst [vmem:[#allocation4 + $0x40] sm:$0xff] %v4049_v63   ;;  %v1570_v9 = vadd.f32 %v1569_v1, %v5550_v40 }
 0x203   : > { %4164 = vst [vmem:[#allocation4 + $0x60] sm:$0xff] %v4069_v0   ;;  %v1571_v3 = vpop.f32.mrf.mxu0  ;;  %v1610_v10 = vadd.f32 %v1609_v2, %v5550_v40 }
 0x204   : > { %v1611_v4 = vpop.f32.mrf.mxu1  ;;  %v1572_v7 = vadd.f32 %v1571_v3, %v5547_v39 }
 0x205   : > { %v1612_v8 = vadd.f32 %v1611_v4, %v5547_v39  ;;  %v1573_v11 = vpop.f32.mrf.mxu0 }
 0x206   : > { %v1613_v12 = vpop.f32.mrf.mxu1  ;;  %v3934_v13 = vpack.c.bf16 %v1572_v7, %v1568_v5  ;;  %v1574_v15 = vadd.f32 %v1573_v11, %v5550_v40 }
 0x207   : > { %v3954_v14 = vpack.c.bf16 %v1612_v8, %v1608_v6  ;;  %v1614_v16 = vadd.f32 %v1613_v12, %v5550_v40  ;;  %v1577_v17 = vpop.f32.mrf.mxu0 }
 0x208   : > { %v1617_v18 = vpop.f32.mrf.mxu1  ;;  %4140 = vst [vmem:[#allocation4 + $0x8] sm:$0xff] %v3934_v13   ;;  %v4054_v19 = vpack.c.bf16 %v1574_v15, %v1570_v9  ;;  %v1578_v25 = vadd.f32 %v1577_v17, %v5547_v39 }
 0x209   : > { %4144 = vst [vmem:[#allocation4 + $0x28] sm:$0xff] %v3954_v14   ;;  %v4074_v20 = vpack.c.bf16 %v1614_v16, %v1610_v10  ;;  %v1579_v21 = vpop.f32.mrf.mxu0  ;;  %v1618_v26 = vadd.f32 %v1617_v18, %v5547_v39 }
 0x20a   : > { %v1619_v22 = vpop.f32.mrf.mxu1  ;;  %4161 = vst [vmem:[#allocation4 + $0x48] sm:$0xff] %v4054_v19   ;;  %v1580_v29 = vadd.f32 %v1579_v21, %v5550_v40 }
 0x20b   : > { %4165 = vst [vmem:[#allocation4 + $0x68] sm:$0xff] %v4074_v20   ;;  %v1581_v23 = vpop.f32.mrf.mxu0  ;;  %v1620_v30 = vadd.f32 %v1619_v22, %v5550_v40 }
 0x20c   : > { %v1621_v24 = vpop.f32.mrf.mxu1  ;;  %v1582_v27 = vadd.f32 %v1581_v23, %v5547_v39 }
 0x20d   : > { %v1622_v28 = vadd.f32 %v1621_v24, %v5547_v39  ;;  %v1583_v31 = vpop.f32.mrf.mxu0 }
 0x20e   : > { %v1623_v32 = vpop.f32.mrf.mxu1  ;;  %v3939_v33 = vpack.c.bf16 %v1582_v27, %v1578_v25  ;;  %v1584_v35 = vadd.f32 %v1583_v31, %v5550_v40 }
 0x20f   : > { %v3959_v34 = vpack.c.bf16 %v1622_v28, %v1618_v26  ;;  %v1624_v36 = vadd.f32 %v1623_v32, %v5550_v40  ;;  %v1587_v37 = vpop.f32.mrf.mxu0 }
 0x210   : > { %v1627_v56 = vpop.f32.mrf.mxu1  ;;  %4141 = vst [vmem:[#allocation4 + $0x10] sm:$0xff] %v3939_v33   ;;  %v4059_v57 = vpack.c.bf16 %v1584_v35, %v1580_v29  ;;  %v1588_v60 = vadd.f32 %v1587_v37, %v5547_v39 }
 0x211   : > { %4145 = vst [vmem:[#allocation4 + $0x30] sm:$0xff] %v3959_v34   ;;  %v4079_v38 = vpack.c.bf16 %v1624_v36, %v1620_v30  ;;  %v1589_v41 = vpop.f32.mrf.mxu0  ;;  %v1628_v44 = vadd.f32 %v1627_v56, %v5547_v39 }
 0x212   : > { %v1629_v42 = vpop.f32.mrf.mxu1  ;;  %4162 = vst [vmem:[#allocation4 + $0x50] sm:$0xff] %v4059_v57   ;;  %v1590_v47 = vadd.f32 %v1589_v41, %v5550_v40 }
 0x213   : > { %4166 = vst [vmem:[#allocation4 + $0x70] sm:$0xff] %v4079_v38   ;;  %v1591_v43 = vpop.f32.mrf.mxu0  ;;  %v1630_v48 = vadd.f32 %v1629_v42, %v5550_v40 }
 0x214   : > { %v1631_v58 = vpop.f32.mrf.mxu1  ;;  %v1592_v45 = vadd.f32 %v1591_v43, %v5547_v39 }
 0x215   : > { %v1632_v46 = vadd.f32 %v1631_v58, %v5547_v39  ;;  %v1593_v49 = vpop.f32.mrf.mxu0 }
 0x216   : > { %v1633_v51 = vpop.f32.mrf.mxu1  ;;  %v3944_v52 = vpack.c.bf16 %v1592_v45, %v1588_v60  ;;  %v1594_v55 = vadd.f32 %v1593_v49, %v5550_v40 }
 0x217   : > { %v3964_v54 = vpack.c.bf16 %v1632_v46, %v1628_v44  ;;  %v1634_v59 = vadd.f32 %v1633_v51, %v5550_v40 }
 0x218   : > { %4142 = vst [vmem:[#allocation4 + $0x18] sm:$0xff] %v3944_v52   ;;  %v4064_v61 = vpack.c.bf16 %v1594_v55, %v1590_v47 }
 0x219   : > { %4146 = vst [vmem:[#allocation4 + $0x38] sm:$0xff] %v3964_v54   ;;  %v4084_v62 = vpack.c.bf16 %v1634_v59, %v1630_v48 }
 0x21a   : > { %4163 = vst [vmem:[#allocation4 + $0x58] sm:$0xff] %v4064_v61  }
 0x21b   : > { %4167 = vst [vmem:[#allocation4 + $0x78] sm:$0xff] %v4084_v62  }
 0x21c LB: >> { %s5593_s30 = sshll.u32 %s5014_s14, 6  ;;  %s2124_s14 = sadd.s32 1, %s5014_s14   ;;  %s5014_s14 = sphi %s5587_s14, %s2124_s14  }
 0x21d   : >> { %s2145_s29 = scalar_lea.vmem [#allocation3], %s5593_s30  ;;  %s5597_s12 = scalar_lea.vmem [#allocation2], %s5593_s30 }
 0x21e   : >> { %v4590_v39 = vld [vmem:[%s2145_s29 + $0x38] sm:$0xff]   ;;  %v4591_v40 = vld [vmem:[%s2145_s29 + $0x30] sm:$0xff]   ;;  %v4592_v63 = vld [vmem:[%s2145_s29 + $0x28] sm:$0xff]   ;;  %s5608_s16 = scalar_lea.vmem [#allocation4], %s5593_s30  ;;  %s5659_s20 = scalar_lea.vmem [#allocation5], %s5593_s30 }
 0x21f   : >> { %4207 = vmatprep.subr.bf16.mxu0 %v4590_v39  ;;  %v4598_v0 = vld [vmem:[%s5597_s12] sm:$0xff]   ;;  %v4594_v2 = vld [vmem:[%s2145_s29 + $0x18] sm:$0xff]   ;;  %v4595_v3 = vld [vmem:[%s2145_s29 + $0x10] sm:$0xff]   ;;  %p2121_p4 = scmp.ge.s32.totalorder %s2124_s14, 2  }
 0x220   : >> { %4208 = vmatpush3.bf16.xpose.msra.mxu0 %v4590_v39  ;;  %4223 = vmatprep.mubr.bf16.mxu0 %v4598_v0  ;;  %v4593_v1 = vld [vmem:[%s2145_s29 + $0x20] sm:$0xff]   ;;  %v4596_v4 = vld [vmem:[%s2145_s29 + $0x8] sm:$0xff]   ;;  %v4600_v7 = vld [vmem:[%s5597_s12 + $0x10] sm:$0xff]   ;;  %s3845_s24 = sshll.u32 (%p2121_p4), %s5111_s21, 12  ;;  %s3244_s25 = sshll.u32 (%p2121_p4), %s5585_s5, 4  ;;  %s5746_s25 = int_to_ptr.vmem [resolvable:$true] %s3244_s25 }
 0x221   : >> { %4209 = vmatprep.subr.bf16.mxu0 %v4591_v40  ;;  %v4597_v5 = vld [vmem:[%s2145_s29] sm:$0xff]   ;;  %v4599_v6 = vld [vmem:[%s5597_s12 + $0x8] sm:$0xff]   ;;  %v4601_v8 = vld [vmem:[%s5597_s12 + $0x18] sm:$0xff]   ;;  %s5865_s27 = sld [smem:[#allocation28_spill]] (%p2121_p4)  ;;  %s3231_s21 = scalar_lea.sflag (%p2121_p4), [#allocation8], %s5329_s0 }
 0x222   : >> { %v4602_v9 = vld [vmem:[%s5597_s12 + $0x20] sm:$0xff]   ;;  %v4603_v10 = vld [vmem:[%s5597_s12 + $0x28] sm:$0xff]   ;;  %v4604_v11 = vld [vmem:[%s5597_s12 + $0x30] sm:$0xff]   ;;  %s5866_s13 = sld [smem:[#allocation33_spill]] (%p2121_p4)  ;;  %s4930_s28 = scalar_lea.vmem (%p2121_p4), %s5746_s25, 4096 }
 0x223   : >> { %v4605_v12 = vld [vmem:[%s5597_s12 + $0x38] sm:$0xff]   ;;  %v4607_v14 = vld [vmem:[%s5608_s16 + $0x30] sm:$0xff]   ;;  %v4608_v22 = vld [vmem:[%s5608_s16 + $0x28] sm:$0xff]   ;;  %p4931_p8 = scmp.ne.s32.totalorder (%p2121_p4), %s5746_s25, %s4930_s28  ;;  %s5027_s26 = smov (%p2121_p4), [#allocation18]  }
 0x224   : >> { %v4606_v13 = vld [vmem:[%s5608_s16 + $0x38] sm:$0xff]   ;;  %v4609_v25 = vld [vmem:[%s5608_s16 + $0x20] sm:$0xff]   ;;  %v4611_v31 = vld [vmem:[%s5608_s16 + $0x10] sm:$0xff]   ;;  %s4934_s17 = sshll.u32 (%p2121_p4), %s5027_s26, 4  ;;  %s4935_s17 = int_to_ptr.vmem [resolvable:$false] %s4934_s17 }
 0x225   : >> { %4239 = vmatprep.subr.bf16.mxu1 %v4606_v13  ;;  %v4610_v28 = vld [vmem:[%s5608_s16 + $0x18] sm:$0xff]   ;;  %v4612_v34 = vld [vmem:[%s5608_s16 + $0x8] sm:$0xff]   ;;  %v4613_v36 = vld [vmem:[%s5608_s16] sm:$0xff]   ;;  %s4936_s14 = scalar_lea.vmem (%p2121_p4), %s4935_s17, 8192  ;;  %p4937_p5 = scmp.lt.s32.totalorder (%p2121_p4), %s5746_s25, %s4935_s17 }
 0x226   : >> { %4240 = vmatpush3.bf16.msra.mxu1 %v4606_v13  ;;  %p4938_p3 = scmp.lt.s32.totalorder (%p2121_p4), %s4936_s14, %s4930_s28 }
 0x227   : >> { %4241 = vmatprep.subr.bf16.mxu1 %v4607_v14  ;;  %p5867_p11 = scmp.ne.s32.totalorder (%p2121_p4), %s5865_s27, 0 }
 0x228   : >> { %4210 = vmatpush3.bf16.xpose.msra.mxu0 %v4591_v40  ;;  %s5744_s3 = scalar_lea.hbm (%p2121_p4), %s5866_s13, %s3845_s24  ;;  %p4939_p6 = por (%p2121_p4), %p4938_p3, %p4937_p5 }
 0x229   : >> { %4211 = vmatprep.subr.bf16.mxu0 %v4592_v63  ;;  %p4932_p12 = pnand (%p2121_p4), %p4931_p8, %p5867_p11 }
 0x22a   : >> { %4242 = vmatpush3.bf16.msra.mxu1 %v4607_v14 }
 0x22b   : >> { %4243 = vmatprep.subr.bf16.mxu1 %v4608_v22  ;;  %p4933_p10 = pneg (%p2121_p4), %p4932_p12 }
 0x22d   : > { %p4940_p13 = pnand (%p2121_p4), %p4939_p6, %p4933_p10 }
 0x22e   : >> { %4244 = vmatpush3.bf16.msra.mxu1 %v4608_v22 }
 0x22f   : >> { %4245 = vmatprep.subr.bf16.mxu1 %v4609_v25 }
 0x230   : >> { %4212 = vmatpush3.bf16.xpose.msra.mxu0 %v4592_v63 }
 0x231   : >> { %4213 = vmatprep.subr.bf16.mxu0 %v4593_v1 }
 0x232   : >> { %4246 = vmatpush3.bf16.msra.mxu1 %v4609_v25 }
 0x233   : >> { %4247 = vmatprep.subr.bf16.mxu1 %v4610_v28 }
 0x236   : >> { %4248 = vmatpush3.bf16.msra.mxu1 %v4610_v28 }
 0x237   : >> { %4249 = vmatprep.subr.bf16.mxu1 %v4611_v31 }
 0x238   : >> { %4214 = vmatpush3.bf16.xpose.msra.mxu0 %v4593_v1 }
 0x239   : >> { %4215 = vmatprep.subr.bf16.mxu0 %v4594_v2 }
 0x23a   : >> { %4250 = vmatpush3.bf16.msra.mxu1 %v4611_v31 }
 0x23b   : >> { %4251 = vmatprep.subr.bf16.mxu1 %v4612_v34 }
 0x23e   : >> { %4252 = vmatpush3.bf16.msra.mxu1 %v4612_v34 }
 0x23f   : >> { %4253 = vmatprep.subr.bf16.mxu1 %v4613_v36 }
 0x240   : >> { %4216 = vmatpush3.bf16.xpose.msra.mxu0 %v4594_v2 }
 0x241   : >> { %4217 = vmatprep.subr.bf16.mxu0 %v4595_v3 }
 0x242   : >> { %4254 = vmatpush3.bf16.msra.mxu1 %v4613_v36 }
 0x248   : >> { %4218 = vmatpush3.bf16.xpose.msra.mxu0 %v4595_v3 }
 0x249   : >> { %4219 = vmatprep.subr.bf16.mxu0 %v4596_v4 }
 0x250   : >> { %4220 = vmatpush3.bf16.xpose.msra.mxu0 %v4596_v4 }
 0x251   : >> { %4221 = vmatprep.subr.bf16.mxu0 %v4597_v5 }
 0x258   : >> { %4222 = vmatpush3.bf16.xpose.msra.mxu0 %v4597_v5 }
 0x25f   : >> { %4224 = vmatmul.mubr.bf16.vlgmr.msra.gmra.mxu0 %v4599_v6 }
 0x260   : >> { %4227 = vmatprep.mubr.bf16.mxu0 %v4600_v7 }
 0x267   : >> { %4228 = vmatmul.mubr.bf16.gmra.mxu0 %v4601_v8 }
 0x268   : >> { %4231 = vmatprep.mubr.bf16.mxu0 %v4602_v9 }
 0x26f   : >> { %4232 = vmatmul.mubr.bf16.gmra.mxu0 %v4603_v10 }
 0x270   : >> { %4235 = vmatprep.mubr.bf16.mxu0 %v4604_v11 }
 0x277   : >> { %4236 = vmatmul.mubr.bf16.gmra.mxu0 %v4605_v12 }
 0x31f   : >> { %v4225_v15 = vpop.f32.mrf.mxu0 }
 0x320   : >> { %2377 = vmax.xlane.f32.xlu1 %v4225_v15 }
 0x321   : >> { %v2310_v16 = vpop.f32.mrf.mxu0 }
 0x322   : >> { %2373 = vmax.xlane.f32.xlu0 %v2310_v16 }
 0x323   : >> { %v4226_v17 = vpop.f32.mrf.mxu0 }
 0x324   : >> { %2379 = vmax.xlane.f32.xlu1 %v4226_v17 }
 0x325   : >> { %v2313_v18 = vpop.f32.mrf.mxu0 }
 0x326   : >> { %2375 = vmax.xlane.f32.xlu0 %v2313_v18 }
 0x327   : >> { %v5612_v19 = vpop.f32.mrf.mxu0 }
 0x329   : >> { %v2326_v20 = vpop.f32.mrf.mxu0 }
 0x32a   : >> { %2381 = vmax.xlane.f32.xlu0 %v2326_v20 }
 0x32b   : >> { %v5614_v21 = vpop.f32.mrf.mxu0 }
 0x32d   : >> { %v2329_v23 = vpop.f32.mrf.mxu0 }
 0x32e   : >> { %2385 = vmax.xlane.f32.xlu0 %v5612_v19  ;;  %2383 = vmax.xlane.f32.xlu1 %v2329_v23 }
 0x32f   : >> { %v5618_v24 = vpop.f32.mrf.mxu0 }
 0x331   : >> { %v5621_v26 = vpop.f32.mrf.mxu0 }
 0x332   : >> { %2387 = vmax.xlane.f32.xlu1 %v5614_v21  ;;  %2389 = vmax.xlane.f32.xlu0 %v5621_v26 }
 0x333   : >> { %v5625_v27 = vpop.f32.mrf.mxu0 }
 0x335   : >> { %v5628_v29 = vpop.f32.mrf.mxu0 }
 0x336   : >> { %2393 = vmax.xlane.f32.xlu0 %v5618_v24  ;;  %2391 = vmax.xlane.f32.xlu1 %v5628_v29 }
 0x337   : >> { %v5632_v30 = vpop.f32.mrf.mxu0 }
 0x339   : >> { %v5635_v32 = vpop.f32.mrf.mxu0 }
 0x33a   : >> { %2395 = vmax.xlane.f32.xlu1 %v5625_v27  ;;  %2397 = vmax.xlane.f32.xlu0 %v5635_v32 }
 0x33b   : >> { %v5639_v33 = vpop.f32.mrf.mxu0 }
 0x33d   : >> { %v5642_v35 = vpop.f32.mrf.mxu0 }
 0x33e   : >> { %2401 = vmax.xlane.f32.xlu0 %v5632_v30  ;;  %2399 = vmax.xlane.f32.xlu1 %v5642_v35 }
 0x342   : >> { %2403 = vmax.xlane.f32.xlu1 %v5639_v33 }
 0x3a9   : >> { %v2378_v37 = vpop.xlane.xlu1 %2377 }
 0x3aa   : >> { %v2407_v56 = vsub.f32 %v4225_v15, %v2378_v37 }
 0x3ab   : >> { %v2374_v57 = vpop.xlane.xlu0 %2373 }
 0x3ac   : >> { %v2425_v38 = vmul.f32 1.442695, %v2407_v56  ;;  %v2405_v41 = vsub.f32 %v2310_v16, %v2374_v57 }
 0x3ad   : >> { %v2380_v42 = vpop.xlane.xlu1 %2379 }
 0x3ae   : >> { %4614 = vpow2.f32 %v2425_v38  ;;  %v2421_v43 = vmul.f32 1.442695, %v2405_v41  ;;  %v2408_v58 = vsub.f32 %v4226_v17, %v2380_v42 }
 0x3af   : >> { %v2376_v60 = vpop.xlane.xlu0 %2375 }
 0x3b0   : >> { %v2427_v44 = vmul.f32 1.442695, %v2408_v58  ;;  %v2406_v45 = vsub.f32 %v2313_v18, %v2376_v60  ;;  %4616 = vpow2.f32 %v2421_v43 }
 0x3b2   : >> { %4618 = vpow2.f32 %v2427_v44  ;;  %v2423_v46 = vmul.f32 1.442695, %v2406_v45 }
 0x3b3   : >> { %v2382_v47 = vpop.xlane.xlu0 %2381 }
 0x3b4   : >> { %4620 = vpow2.f32 %v2423_v46  ;;  %v2409_v48 = vsub.f32 %v2326_v20, %v2382_v47 }
 0x3b6   : >> { %v2429_v49 = vmul.f32 1.442695, %v2409_v48 }
 0x3b7   : >> { %v2386_v51 = vpop.xlane.xlu0 %2385  ;;  %v2384_v52 = vpop.xlane.xlu1 %2383 }
 0x3b8   : >> { %v2411_v54 = vsub.f32 %v5612_v19, %v2386_v51  ;;  %v2410_v55 = vsub.f32 %v2329_v23, %v2384_v52  ;;  %4622 = vpow2.f32 %v2429_v49 }
 0x3ba   : >> { %v2433_v59 = vmul.f32 1.442695, %v2411_v54  ;;  %v2431_v61 = vmul.f32 1.442695, %v2410_v55 }
 0x3bb   : >> { %v4615_v62 = vpop.eup %4614  ;;  %v2388_v39 = vpop.xlane.xlu1 %2387 }
 0x3bc   : >> { %v2390_v40 = vpop.xlane.xlu0 %2389  ;;  %4624 = vpow2.f32 %v2433_v59  ;;  %v2412_v63 = vsub.f32 %v5614_v21, %v2388_v39  ;;  %2457 = vadd.xlane.f32.xlu0 %v4615_v62 }
 0x3bd   : >> { %v2413_v0 = vsub.f32 %v5621_v26, %v2390_v40  ;;  %4626 = vpow2.f32 %v2431_v61  ;;  %v4617_v1 = vpop.eup %4616 }
 0x3be   : >> { %v2435_v2 = vmul.f32 1.442695, %v2412_v63 }
 0x3bf   : >> { %v4619_v3 = vpop.eup %4618  ;;  %v2437_v4 = vmul.f32 1.442695, %v2413_v0  ;;  %v2392_v6 = vpop.xlane.xlu1 %2391 }
 0x3c0   : >> { %v2394_v5 = vpop.xlane.xlu0 %2393  ;;  %4628 = vpow2.f32 %v2435_v2  ;;  %v2414_v8 = vsub.f32 %v5628_v29, %v2392_v6  ;;  %2453 = vadd.xlane.f32.xlu0 %v4617_v1  ;;  %2459 = vadd.xlane.f32.xlu1 %v4619_v3  ;;  %v2486_v15 = vpack.c.bf16 %v4619_v3, %v4615_v62 }
 0x3c1   : >> { %v2415_v7 = vsub.f32 %v5618_v24, %v2394_v5  ;;  %v4621_v9 = vpop.eup %4620  ;;  %4630 = vpow2.f32 %v2437_v4 }
 0x3c2   : >> { %v2439_v11 = vmul.f32 1.442695, %v2414_v8  ;;  %v2485_v12 = vpack.c.bf16 %v4621_v9, %v4617_v1 }
 0x3c3   : >> { %v2441_v10 = vmul.f32 1.442695, %v2415_v7  ;;  %v2396_v13 = vpop.xlane.xlu1 %2395 }
 0x3c4   : >> { %v2398_v14 = vpop.xlane.xlu0 %2397  ;;  %v2416_v16 = vsub.f32 %v5625_v27, %v2396_v13  ;;  %4255 = vmatprep.mubr.bf16.mxu1 %v2485_v12  ;;  %2455 = vadd.xlane.f32.xlu1 %v4621_v9 }
 0x3c5   : >> { %4632 = vpow2.f32 %v2441_v10  ;;  %v2417_v17 = vsub.f32 %v5635_v32, %v2398_v14  ;;  %4256 = vmatmul.mubr.bf16.vlgmr.msra.gmra.mxu1 %v2486_v15  ;;  %v4623_v21 = vpop.eup %4622 }
 0x3c6   : >> { %4634 = vpow2.f32 %v2439_v11  ;;  %v2443_v18 = vmul.f32 1.442695, %v2416_v16 }
 0x3c7   : >> { %v2400_v20 = vpop.xlane.xlu1 %2399  ;;  %v2445_v22 = vmul.f32 1.442695, %v2417_v17 }
 0x3c8   : >> { %v2402_v19 = vpop.xlane.xlu0 %2401  ;;  %4636 = vpow2.f32 %v2443_v18  ;;  %v2418_v24 = vsub.f32 %v5642_v35, %v2400_v20 }
 0x3c9   : >> { %v2419_v23 = vsub.f32 %v5632_v30, %v2402_v19  ;;  %v4625_v25 = vpop.eup %4624  ;;  %4638 = vpow2.f32 %v2445_v22 }
 0x3ca   : >> { %v4627_v26 = vpop.eup %4626  ;;  %v2447_v28 = vmul.f32 1.442695, %v2418_v24  ;;  %2465 = vadd.xlane.f32.xlu0 %v4625_v25 }
 0x3cb   : >> { %v2449_v27 = vmul.f32 1.442695, %v2419_v23  ;;  %v2404_v29 = vpop.xlane.xlu1 %2403  ;;  %v2487_v31 = vpack.c.bf16 %v4627_v26, %v4623_v21 }
 0x3cc   : >> { %v2420_v32 = vsub.f32 %v5639_v33, %v2404_v29  ;;  %4640 = vpow2.f32 %v2447_v28 }
 0x3cd   : >> { %v4629_v34 = vpop.eup %4628  ;;  %4259 = vmatprep.mubr.bf16.mxu1 %v2487_v31  ;;  %4642 = vpow2.f32 %v2449_v27 }
 0x3ce   : >> { %v2451_v36 = vmul.f32 1.442695, %v2420_v32  ;;  %2461 = vadd.xlane.f32.xlu0 %v4623_v21  ;;  %2467 = vadd.xlane.f32.xlu1 %v4629_v34  ;;  %v2488_v37 = vpack.c.bf16 %v4629_v34, %v4625_v25  ;;  %v4631_v30 = vpop.eup %4630 }
 0x3d0   : >> { %4644 = vpow2.f32 %v2451_v36  ;;  %4260 = vmatmul.mubr.bf16.gmra.mxu1 %v2488_v37 }
 0x3d2   : >> { %v4633_v35 = vpop.eup %4632  ;;  %2463 = vadd.xlane.f32.xlu1 %v4627_v26 }
 0x3d3   : >> { %v4635_v56 = vpop.eup %4634  ;;  %2473 = vadd.xlane.f32.xlu0 %v4633_v35 }
 0x3d4   : >> { %v2489_v57 = vpack.c.bf16 %v4635_v56, %v4631_v30 }
 0x3d5   : >> { %v4637_v38 = vpop.eup %4636 }
 0x3d6   : >> { %4263 = vmatprep.mubr.bf16.mxu1 %v2489_v57  ;;  %2475 = vadd.xlane.f32.xlu1 %v4637_v38  ;;  %v2490_v33 = vpack.c.bf16 %v4637_v38, %v4633_v35  ;;  %v4639_v41 = vpop.eup %4638 }
 0x3d7   : >> { %2469 = vadd.xlane.f32.xlu0 %v4631_v30 }
 0x3d8   : >> { %4264 = vmatmul.mubr.bf16.gmra.mxu1 %v2490_v33 }
 0x3d9   : >> { %v4641_v42 = vpop.eup %4640 }
 0x3da   : >> { %2471 = vadd.xlane.f32.xlu1 %v4635_v56  ;;  %v2491_v43 = vpack.c.bf16 %v4641_v42, %v4639_v41  ;;  %v4643_v58 = vpop.eup %4642 }
 0x3db   : >> { %2477 = vadd.xlane.f32.xlu0 %v4639_v41 }
 0x3dc   : >> { %4267 = vmatprep.mubr.bf16.mxu1 %v2491_v43 }
 0x3dd   : >> { %v4645_v60 = vpop.eup %4644 }
 0x3de   : >> { %2479 = vadd.xlane.f32.xlu1 %v4641_v42  ;;  %v2492_v44 = vpack.c.bf16 %v4645_v60, %v4643_v58 }
 0x3df   : >> { %2481 = vadd.xlane.f32.xlu0 %v4643_v58 }
 0x3e0   : >> { %4268 = vmatmul.mubr.bf16.gmra.mxu1 %v2492_v44 }
 0x3e2   : >> { %2483 = vadd.xlane.f32.xlu1 %v4645_v60 }
 0x445   : >> { %v2458_v45 = vpop.xlane.xlu0 %2457 }
 0x446   : >> { %4646 = vrcp.f32 %v2458_v45 }
 0x449   : >> { %v2460_v46 = vpop.xlane.xlu1 %2459  ;;  %v2454_v47 = vpop.xlane.xlu0 %2453 }
 0x44a   : >> { %4648 = vrcp.f32 %v2460_v46 }
 0x44b   : >> { %4650 = vrcp.f32 %v2454_v47 }
 0x44d   : >> { %v2456_v48 = vpop.xlane.xlu1 %2455 }
 0x44e   : >> { %4652 = vrcp.f32 %v2456_v48 }
 0x453   : >> { %v2466_v49 = vpop.xlane.xlu0 %2465  ;;  %v4647_v40 = vpop.eup %4646 }
 0x454   : >> { %4654 = vrcp.f32 %v2466_v49 }
 0x457   : >> { %v2468_v51 = vpop.xlane.xlu1 %2467  ;;  %v2462_v52 = vpop.xlane.xlu0 %2461 }
 0x458   : >> { %4656 = vrcp.f32 %v2468_v51  ;;  %v4649_v0 = vpop.eup %4648 }
 0x459   : >> { %4658 = vrcp.f32 %v2462_v52  ;;  %v4651_v2 = vpop.eup %4650 }
 0x45b   : >> { %v2464_v54 = vpop.xlane.xlu1 %2463  ;;  %v4653_v5 = vpop.eup %4652 }
 0x45c   : >> { %v2474_v55 = vpop.xlane.xlu0 %2473  ;;  %4660 = vrcp.f32 %v2464_v54 }
 0x45d   : >> { %4662 = vrcp.f32 %v2474_v55 }
 0x45f   : >> { %v2476_v59 = vpop.xlane.xlu1 %2475 }
 0x460   : >> { %v2470_v62 = vpop.xlane.xlu0 %2469  ;;  %4664 = vrcp.f32 %v2476_v59 }
 0x461   : >> { %4666 = vrcp.f32 %v2470_v62  ;;  %v4655_v15 = vpop.eup %4654  ;;  %v4680_v62 = vld [vmem:[#allocation17 + $0x70] ss:$8 sps:$4 sm:$0xff] (%p2121_p4)  }
 0x463   : >> { %v2472_v63 = vpop.xlane.xlu1 %2471 }
 0x464   : >> { %v2478_v10 = vpop.xlane.xlu0 %2477  ;;  %4668 = vrcp.f32 %v2472_v63  ;;  %v4684_v63 = vld [vmem:[#allocation17 + $0x54] ss:$8 sps:$4 sm:$0xff] (%p2121_p4)  }
 0x465   : >> { %v4657_v17 = vpop.eup %4656 }
 0x466   : >> { %v4659_v20 = vpop.eup %4658 }
 0x467   : >> { %v2480_v11 = vpop.xlane.xlu1 %2479 }
 0x468   : >> { %v2482_v16 = vpop.xlane.xlu0 %2481 }
 0x469   : >> { %v4661_v23 = vpop.eup %4660  ;;  %4670 = vrcp.f32 %v2482_v16  ;;  %v4707_v16 = vld [vmem:[#allocation17 + $0xe0] ss:$8 sps:$4 sm:$0xff] (%p2121_p4)  }
 0x46a   : >> { %v4663_v32 = vpop.eup %4662 }
 0x46b   : >> { %v2484_v18 = vpop.xlane.xlu1 %2483 }
 0x46c   : >> { %4672 = vrcp.f32 %v2484_v18  ;;  %v4710_v18 = vld [vmem:[#allocation17 + $0xd0] ss:$8 sps:$4 sm:$0xff] (%p2121_p4)  }
 0x46d   : >> { %4674 = vrcp.f32 %v2478_v10  ;;  %v4665_v34 = vpop.eup %4664 }
 0x46e   : >> { %4676 = vrcp.f32 %v2480_v11  ;;  %v4667_v37 = vpop.eup %4666  ;;  %v4699_v11 = vld [vmem:[#allocation17 + $0x4] ss:$8 sps:$4 sm:$0xff] (%p2121_p4)  }
 0x471   : >> { %v4669_v56 = vpop.eup %4668 }
 0x476   : >> { %v4671_v60 = vpop.eup %4670 }
 0x479   : >> { %v4673_v44 = vpop.eup %4672 }
 0x47a   : >> { %v4675_v46 = vpop.eup %4674 }
 0x47b   : >> { %v4677_v49 = vpop.eup %4676 }
 0x485   : >> { %v4257_v61 = vpop.f32.mrf.mxu1 }
 0x486   : >> { %v2656_v3 = vmul.f32 %v4647_v40, %v4257_v61  ;;  %v4678_v61 = vld [vmem:[#allocation17 + $0x74] ss:$8 sps:$4 sm:$0xff] (%p2121_p4)   ;;  %v4683_v40 = vld [vmem:[#allocation17 + $0x60] ss:$8 sps:$4 sm:$0xff] (%p2121_p4)  }
 0x487   : >> { %v2575_v39 = vpop.f32.mrf.mxu1  ;;  %3085 = vmatprep.subr.bf16.mxu0 (%p2121_p4), %v4678_v61  ;;  %4303 = vmatprep.subr.bf16.mxu1 (%p2121_p4), %v4678_v61 }
 0x488   : >> { %v2654_v7 = vmul.f32 %v4651_v2, %v2575_v39  ;;  %v4681_v39 = vld [vmem:[#allocation17 + $0x64] ss:$8 sps:$4 sm:$0xff] (%p2121_p4)   ;;  %3086 = vmatpush1.bf16.msra.mxu0 (%p2121_p4), %v4680_v62  ;;  %4319 = vmatpush1.bf16.msra.mxu1 (%p2121_p4), %v4680_v62  ;;  %v4689_v2 = vld [vmem:[#allocation17 + $0x40] ss:$8 sps:$4 sm:$0xff] (%p2121_p4)  }
 0x489   : >> { %v4258_v1 = vpop.f32.mrf.mxu1  ;;  %3087 = vmatprep.subr.bf16.mxu0 (%p2121_p4), %v4681_v39  ;;  %4304 = vmatprep.subr.bf16.mxu1 (%p2121_p4), %v4681_v39 }
 0x48a   : >> { %v2657_v4 = vmul.f32 %v4649_v0, %v4258_v1  ;;  %v4686_v0 = vld [vmem:[#allocation17 + $0x50] ss:$8 sps:$4 sm:$0xff] (%p2121_p4)   ;;  %v4687_v1 = vld [vmem:[#allocation17 + $0x44] ss:$8 sps:$4 sm:$0xff] (%p2121_p4)  }
 0x48b   : >> { %v2578_v6 = vpop.f32.mrf.mxu1 }
 0x48c   : >> { %v4094_v8 = vpack.c.bf16 %v2657_v4, %v2656_v3  ;;  %v2655_v9 = vmul.f32 %v4653_v5, %v2578_v6  ;;  %3088 = vmatpush1.bf16.msra.mxu0 (%p2121_p4), %v4683_v40  ;;  %4320 = vmatpush1.bf16.msra.mxu1 (%p2121_p4), %v4683_v40  ;;  %v4690_v3 = vld [vmem:[#allocation17 + $0x34] ss:$8 sps:$4 sm:$0xff] (%p2121_p4)   ;;  %v4692_v4 = vld [vmem:[#allocation17 + $0x30] ss:$8 sps:$4 sm:$0xff] (%p2121_p4)   ;;  %v4693_v5 = vld [vmem:[#allocation17 + $0x24] ss:$8 sps:$4 sm:$0xff] (%p2121_p4)  }
 0x48d   : > { %3089 = vmatprep.subr.bf16.mxu0 (%p2121_p4), %v4684_v63  ;;  %4305 = vmatprep.subr.bf16.mxu1 (%p2121_p4), %v4684_v63  ;;  %v4695_v6 = vld [vmem:[#allocation17 + $0x20] ss:$8 sps:$4 sm:$0xff] (%p2121_p4)  }
 0x48e   : >> { %4168 = vst [vmem:[%s5659_s20 + $0x8] sm:$0xff] %v4094_v8   ;;  %v4089_v12 = vpack.c.bf16 %v2655_v9, %v2654_v7  ;;  %v4696_v7 = vld [vmem:[#allocation17 + $0x14] ss:$8 sps:$4 sm:$0xff] (%p2121_p4)   ;;  %v4698_v8 = vld [vmem:[#allocation17 + $0x10] ss:$8 sps:$4 sm:$0xff] (%p2121_p4)  }
 0x490   : >> { %4090 = vst [vmem:[%s5659_s20] sm:$0xff] %v4089_v12   ;;  %v4261_v13 = vpop.f32.mrf.mxu1  ;;  %3090 = vmatpush1.bf16.msra.mxu0 (%p2121_p4), %v4686_v0  ;;  %4321 = vmatpush1.bf16.msra.mxu1 (%p2121_p4), %v4686_v0  ;;  %v4701_v12 = vld [vmem:[#allocation17] ss:$8 sps:$4 sm:$0xff] (%p2121_p4)  }
 0x491   : >> { %v2660_v21 = vmul.f32 %v4655_v15, %v4261_v13  ;;  %3091 = vmatprep.subr.bf16.mxu0 (%p2121_p4), %v4687_v1  ;;  %4306 = vmatprep.subr.bf16.mxu1 (%p2121_p4), %v4687_v1  ;;  %v4702_v13 = vld [vmem:[#allocation17 + $0xf4] ss:$8 sps:$4 sm:$0xff] (%p2121_p4)   ;;  %v4705_v15 = vld [vmem:[#allocation17 + $0xe4] ss:$8 sps:$4 sm:$0xff] (%p2121_p4)  }
 0x492   : >> { %v2591_v14 = vpop.f32.mrf.mxu1 }
 0x493   : >> { %v2658_v25 = vmul.f32 %v4659_v20, %v2591_v14  ;;  %v4704_v14 = vld [vmem:[#allocation17 + $0xf0] ss:$8 sps:$4 sm:$0xff] (%p2121_p4)   ;;  %v4713_v20 = vld [vmem:[#allocation17 + $0xc0] ss:$8 sps:$4 sm:$0xff] (%p2121_p4)  }
 0x494   : >> { %v4262_v19 = vpop.f32.mrf.mxu1  ;;  %3092 = vmatpush1.bf16.msra.mxu0 (%p2121_p4), %v4689_v2  ;;  %4322 = vmatpush1.bf16.msra.mxu1 (%p2121_p4), %v4689_v2 }
 0x495   : >> { %v2661_v22 = vmul.f32 %v4657_v17, %v4262_v19  ;;  %3093 = vmatprep.subr.bf16.mxu0 (%p2121_p4), %v4690_v3  ;;  %4307 = vmatprep.subr.bf16.mxu1 (%p2121_p4), %v4690_v3  ;;  %v4708_v17 = vld [vmem:[#allocation17 + $0xd4] ss:$8 sps:$4 sm:$0xff] (%p2121_p4)   ;;  %v4711_v19 = vld [vmem:[#allocation17 + $0xc4] ss:$8 sps:$4 sm:$0xff] (%p2121_p4)  }
 0x496   : >> { %v2594_v24 = vpop.f32.mrf.mxu1 }
 0x497   : >> { %v4104_v26 = vpack.c.bf16 %v2661_v22, %v2660_v21  ;;  %v2659_v28 = vmul.f32 %v4661_v23, %v2594_v24  ;;  %v4714_v21 = vld [vmem:[#allocation17 + $0xb4] ss:$8 sps:$4 sm:$0xff] (%p2121_p4)   ;;  %v4716_v22 = vld [vmem:[#allocation17 + $0xb0] ss:$8 sps:$4 sm:$0xff] (%p2121_p4)   ;;  %v4717_v23 = vld [vmem:[#allocation17 + $0xa4] ss:$8 sps:$4 sm:$0xff] (%p2121_p4)  }
 0x498   : >> { %v4265_v27 = vpop.f32.mrf.mxu1  ;;  %3094 = vmatpush1.bf16.msra.mxu0 (%p2121_p4), %v4692_v4  ;;  %4323 = vmatpush1.bf16.msra.mxu1 (%p2121_p4), %v4692_v4  ;;  %v4719_v24 = vld [vmem:[#allocation17 + $0xa0] ss:$8 sps:$4 sm:$0xff] (%p2121_p4)  }
 0x499   : >> { %4170 = vst [vmem:[%s5659_s20 + $0x18] sm:$0xff] %v4104_v26   ;;  %v4099_v29 = vpack.c.bf16 %v2659_v28, %v2658_v25  ;;  %v2664_v30 = vmul.f32 %v4663_v32, %v4265_v27  ;;  %3095 = vmatprep.subr.bf16.mxu0 (%p2121_p4), %v4693_v5  ;;  %4308 = vmatprep.subr.bf16.mxu1 (%p2121_p4), %v4693_v5  ;;  %v4720_v25 = vld [vmem:[#allocation17 + $0x94] ss:$8 sps:$4 sm:$0xff] (%p2121_p4)   ;;  %v4722_v26 = vld [vmem:[#allocation17 + $0x90] ss:$8 sps:$4 sm:$0xff] (%p2121_p4)  }
 0x49a   : >> { %v2607_v31 = vpop.f32.mrf.mxu1  ;;  %v4723_v28 = vld [vmem:[#allocation17 + $0x84] ss:$8 sps:$4 sm:$0xff] (%p2121_p4)   ;;  %v4725_v27 = vld [vmem:[#allocation17 + $0x80] ss:$8 sps:$4 sm:$0xff] (%p2121_p4)  }
 0x49b   : >> { %4169 = vst [vmem:[%s5659_s20 + $0x10] sm:$0xff] %v4099_v29   ;;  %v2662_v38 = vmul.f32 %v4667_v37, %v2607_v31 }
 0x49c   : >> { %v4266_v36 = vpop.f32.mrf.mxu1  ;;  %3096 = vmatpush1.bf16.msra.mxu0 (%p2121_p4), %v4695_v6  ;;  %4324 = vmatpush1.bf16.msra.mxu1 (%p2121_p4), %v4695_v6 }
 0x49d   : >> { %v2665_v35 = vmul.f32 %v4665_v34, %v4266_v36  ;;  %3097 = vmatprep.subr.bf16.mxu0 (%p2121_p4), %v4696_v7  ;;  %4309 = vmatprep.subr.bf16.mxu1 (%p2121_p4), %v4696_v7 }
 0x49e   : >> { %v2610_v57 = vpop.f32.mrf.mxu1 }
 0x49f   : >> { %v4114_v33 = vpack.c.bf16 %v2665_v35, %v2664_v30  ;;  %v2663_v41 = vmul.f32 %v4669_v56, %v2610_v57 }
 0x4a0   : >> { %v4269_v42 = vpop.f32.mrf.mxu1  ;;  %3098 = vmatpush1.bf16.msra.mxu0 (%p2121_p4), %v4698_v8  ;;  %4325 = vmatpush1.bf16.msra.mxu1 (%p2121_p4), %v4698_v8 }
 0x4a1   : >> { %4172 = vst [vmem:[%s5659_s20 + $0x28] sm:$0xff] %v4114_v33   ;;  %v4109_v43 = vpack.c.bf16 %v2663_v41, %v2662_v38  ;;  %v2668_v47 = vmul.f32 %v4671_v60, %v4269_v42  ;;  %3099 = vmatprep.subr.bf16.mxu0 (%p2121_p4), %v4699_v11  ;;  %4310 = vmatprep.subr.bf16.mxu1 (%p2121_p4), %v4699_v11 }
 0x4a2   : >> { %v2623_v58 = vpop.f32.mrf.mxu1 }
 0x4a3   : >> { %4171 = vst [vmem:[%s5659_s20 + $0x20] sm:$0xff] %v4109_v43   ;;  %v2666_v52 = vmul.f32 %v4675_v46, %v2623_v58  ;;  %v2913_v43 = vld [vmem:[%s5805_s10] sm:$0x3] (%p2121_p4) }
 0x4a4   : >> { %v4270_v45 = vpop.f32.mrf.mxu1  ;;  %3100 = vmatpush1.bf16.msra.mxu0 (%p2121_p4), %v4701_v12  ;;  %4326 = vmatpush1.bf16.msra.mxu1 (%p2121_p4), %v4701_v12  ;;  %v5676_v58 = vrot.slane (%p2121_p4), %v2913_v43, %v5457_v50  ;;  %v5679_v60 = vrot.slane (%p2121_p4), %v2913_v43, %v5465_v53 }
 0x4a5   : >> { %v2669_v48 = vmul.f32 %v4673_v44, %v4270_v45  ;;  %3101 = vmatprep.subr.bf16.mxu0 (%p2121_p4), %v4702_v13  ;;  %4311 = vmatprep.subr.bf16.mxu1 (%p2121_p4), %v4702_v13 }
 0x4a6   : >> { %v2626_v51 = vpop.f32.mrf.mxu1 }
 0x4a7   : >> { %v4124_v54 = vpack.c.bf16 %v2669_v48, %v2668_v47  ;;  %v2667_v55 = vmul.f32 %v4677_v49, %v2626_v51  ;;  %2123 = sbr.rel (!%p2121_p4) target bundleno = 540 (0x21c), region = 164 }
 0x4a8   : > { %3102 = vmatpush2.bf16.msra.mxu0 (%p2121_p4), %v4704_v14  ;;  %4327 = vmatpush2.bf16.msra.mxu1 (%p2121_p4), %v4704_v14 }
 0x4a9   : >> { %4174 = vst [vmem:[%s5659_s20 + $0x38] sm:$0xff] %v4124_v54   ;;  %v4119_v59 = vpack.c.bf16 %v2667_v55, %v2666_v52  ;;  %3103 = vmatprep.subr.bf16.mxu0 (%p2121_p4), %v4705_v15  ;;  %4312 = vmatprep.subr.bf16.mxu1 (%p2121_p4), %v4705_v15 }
 0x4ab   : >> { %4173 = vst [vmem:[%s5659_s20 + $0x30] sm:$0xff] %v4119_v59  }
 0x4ac   : > { %3104 = vmatpush2.bf16.msra.mxu0 %v4707_v16  ;;  %4328 = vmatpush2.bf16.msra.mxu1 %v4707_v16 }
 0x4ad   : > { %3105 = vmatprep.subr.bf16.mxu0 %v4708_v17  ;;  %4313 = vmatprep.subr.bf16.mxu1 %v4708_v17 }
 0x4b0   : > { %3106 = vmatpush2.bf16.msra.mxu0 %v4710_v18  ;;  %4329 = vmatpush2.bf16.msra.mxu1 %v4710_v18 }
 0x4b1   : > { %3107 = vmatprep.subr.bf16.mxu0 %v4711_v19  ;;  %4314 = vmatprep.subr.bf16.mxu1 %v4711_v19 }
 0x4b2   : > { %v4726_v9 = vld [vmem:[#allocation5 + $0x40] sm:$0xff]   ;;  %v4730_v32 = vld [vmem:[#allocation5 + $0x48] sm:$0xff]   ;;  %v4734_v30 = vld [vmem:[#allocation5 + $0x50] sm:$0xff]  }
 0x4b3   : > { %v4727_v10 = vld [vmem:[#allocation5 + $0x60] sm:$0xff]   ;;  %3117 = vmatprep.mubr.bf16.mxu0 %v4726_v9  ;;  %v4731_v34 = vld [vmem:[#allocation5 + $0x68] sm:$0xff]   ;;  %v4735_v35 = vld [vmem:[#allocation5 + $0x70] sm:$0xff]  }
 0x4b4   : > { %3157 = vmatprep.mubr.bf16.mxu1 %v4727_v10  ;;  %3108 = vmatpush2.bf16.msra.mxu0 %v4713_v20  ;;  %v4728_v29 = vld [vmem:[#allocation5] sm:$0xff]   ;;  %v4732_v36 = vld [vmem:[#allocation5 + $0x8] sm:$0xff]   ;;  %v4736_v56 = vld [vmem:[#allocation5 + $0x10] sm:$0xff]  }
 0x4b5   : > { %4330 = vmatpush2.bf16.msra.mxu1 %v4713_v20  ;;  %3109 = vmatprep.subr.bf16.mxu0 %v4714_v21  ;;  %v4729_v31 = vld [vmem:[#allocation5 + $0x20] sm:$0xff]   ;;  %v4733_v37 = vld [vmem:[#allocation5 + $0x28] sm:$0xff]   ;;  %v4737_v57 = vld [vmem:[#allocation5 + $0x30] sm:$0xff]  }
 0x4b6   : > { %4315 = vmatprep.subr.bf16.mxu1 %v4714_v21  ;;  %v4738_v38 = vld [vmem:[#allocation5 + $0x58] sm:$0xff]  }
 0x4b7   : > { %v4739_v33 = vld [vmem:[#allocation5 + $0x78] sm:$0xff]  }
 0x4b8   : > { %3110 = vmatpush2.bf16.msra.mxu0 %v4716_v22  ;;  %v4740_v41 = vld [vmem:[#allocation5 + $0x18] sm:$0xff]  }
 0x4b9   : > { %4331 = vmatpush2.bf16.msra.mxu1 %v4716_v22  ;;  %3111 = vmatprep.subr.bf16.mxu0 %v4717_v23  ;;  %v4741_v42 = vld [vmem:[#allocation5 + $0x38] sm:$0xff]  }
 0x4ba   : > { %4316 = vmatprep.subr.bf16.mxu1 %v4717_v23 }
 0x4bc   : > { %3112 = vmatpush2.bf16.msra.mxu0 %v4719_v24 }
 0x4bd   : > { %4332 = vmatpush2.bf16.msra.mxu1 %v4719_v24  ;;  %3113 = vmatprep.subr.bf16.mxu0 %v4720_v25 }
 0x4be   : > { %4317 = vmatprep.subr.bf16.mxu1 %v4720_v25 }
 0x4c0   : > { %3114 = vmatpush2.bf16.msra.mxu0 %v4722_v26 }
 0x4c1   : > { %4333 = vmatpush2.bf16.msra.mxu1 %v4722_v26  ;;  %3115 = vmatprep.subr.bf16.mxu0 %v4723_v28 }
 0x4c2   : > { %4318 = vmatprep.subr.bf16.mxu1 %v4723_v28 }
 0x4c4   : > { %3116 = vmatpush2.bf16.msra.mxu0 %v4725_v27 }
 0x4c5   : > { %4334 = vmatpush2.bf16.msra.mxu1 %v4725_v27 }
 0x4c7   : > { %3118 = vmatmul.mubr.bf16.vlgmr.msra.gmra.mxu0 %v4728_v29 }
 0x4c8   : > { %3158 = vmatmul.mubr.bf16.vlgmr.msra.gmra.mxu1 %v4729_v31  ;;  %3127 = vmatprep.mubr.bf16.mxu0 %v4730_v32 }
 0x4c9   : > { %3167 = vmatprep.mubr.bf16.mxu1 %v4731_v34 }
 0x4cf   : > { %3128 = vmatmul.mubr.bf16.gmra.mxu0 %v4732_v36 }
 0x4d0   : > { %3168 = vmatmul.mubr.bf16.gmra.mxu1 %v4733_v37  ;;  %3137 = vmatprep.mubr.bf16.mxu0 %v4734_v30 }
 0x4d1   : > { %3177 = vmatprep.mubr.bf16.mxu1 %v4735_v35 }
 0x4d7   : > { %3138 = vmatmul.mubr.bf16.gmra.mxu0 %v4736_v56 }
 0x4d8   : > { %3178 = vmatmul.mubr.bf16.gmra.mxu1 %v4737_v57  ;;  %3147 = vmatprep.mubr.bf16.mxu0 %v4738_v38 }
 0x4d9   : > { %3187 = vmatprep.mubr.bf16.mxu1 %v4739_v33 }
 0x4df   : > { %3148 = vmatmul.mubr.bf16.gmra.mxu0 %v4740_v41 }
 0x4e0   : > { %3188 = vmatmul.mubr.bf16.gmra.mxu1 %v4741_v42 }
 0x587   : > { %v3119_v44 = vpop.f32.mrf.mxu0 }
 0x588   : > { %v3159_v45 = vpop.f32.mrf.mxu1  ;;  %v3120_v46 = vadd.f32 %v3119_v44, %v5676_v58 }
 0x589   : > { %v3160_v47 = vadd.f32 %v3159_v45, %v5676_v58  ;;  %v3121_v48 = vpop.f32.mrf.mxu0 }
 0x58a   : > { %v3161_v49 = vpop.f32.mrf.mxu1  ;;  %3198 = vst [vmem:[%s5585_s5] sm:$0xff] %v3120_v46  ;;  %v3122_v51 = vadd.f32 %v3121_v48, %v5679_v60 }
 0x58b   : > { %3214 = vst [vmem:[%s5585_s5 + $0x80] sm:$0xff] %v3160_v47  ;;  %v3162_v50 = vadd.f32 %v3161_v49, %v5679_v60  ;;  %v3123_v53 = vpop.f32.mrf.mxu0 }
 0x58c   : > { %v3163_v52 = vpop.f32.mrf.mxu1  ;;  %3199 = vst [vmem:[%s5585_s5 + $0x8] sm:$0xff] %v3122_v51  ;;  %v3124_v54 = vadd.f32 %v3123_v53, %v5676_v58 }
 0x58d   : > { %3215 = vst [vmem:[%s5585_s5 + $0x88] sm:$0xff] %v3162_v50  ;;  %v3164_v55 = vadd.f32 %v3163_v52, %v5676_v58  ;;  %v3125_v59 = vpop.f32.mrf.mxu0 }
 0x58e   : > { %v3165_v61 = vpop.f32.mrf.mxu1  ;;  %3200 = vst [vmem:[%s5585_s5 + $0x10] sm:$0xff] %v3124_v54  ;;  %v3126_v62 = vadd.f32 %v3125_v59, %v5679_v60 }
 0x58f   : > { %3216 = vst [vmem:[%s5585_s5 + $0x90] sm:$0xff] %v3164_v55  ;;  %v3166_v39 = vadd.f32 %v3165_v61, %v5679_v60  ;;  %v3129_v40 = vpop.f32.mrf.mxu0 }
 0x590   : > { %v3169_v63 = vpop.f32.mrf.mxu1  ;;  %3201 = vst [vmem:[%s5585_s5 + $0x18] sm:$0xff] %v3126_v62  ;;  %v3130_v0 = vadd.f32 %v3129_v40, %v5676_v58 }
 0x591   : > { %3217 = vst [vmem:[%s5585_s5 + $0x98] sm:$0xff] %v3166_v39  ;;  %v3170_v1 = vadd.f32 %v3169_v63, %v5676_v58  ;;  %v3131_v2 = vpop.f32.mrf.mxu0 }
 0x592   : > { %v3171_v3 = vpop.f32.mrf.mxu1  ;;  %3202 = vst [vmem:[%s5585_s5 + $0x20] sm:$0xff] %v3130_v0  ;;  %v3132_v4 = vadd.f32 %v3131_v2, %v5679_v60 }
 0x593   : > { %3218 = vst [vmem:[%s5585_s5 + $0xa0] sm:$0xff] %v3170_v1  ;;  %v3172_v5 = vadd.f32 %v3171_v3, %v5679_v60  ;;  %v3133_v6 = vpop.f32.mrf.mxu0 }
 0x594   : > { %v3173_v7 = vpop.f32.mrf.mxu1  ;;  %3203 = vst [vmem:[%s5585_s5 + $0x28] sm:$0xff] %v3132_v4  ;;  %v3134_v8 = vadd.f32 %v3133_v6, %v5676_v58 }
 0x595   : > { %3219 = vst [vmem:[%s5585_s5 + $0xa8] sm:$0xff] %v3172_v5  ;;  %v3174_v9 = vadd.f32 %v3173_v7, %v5676_v58  ;;  %v3135_v10 = vpop.f32.mrf.mxu0 }
 0x596   : > { %v3175_v11 = vpop.f32.mrf.mxu1  ;;  %3204 = vst [vmem:[%s5585_s5 + $0x30] sm:$0xff] %v3134_v8  ;;  %v3136_v12 = vadd.f32 %v3135_v10, %v5679_v60 }
 0x597   : > { %3220 = vst [vmem:[%s5585_s5 + $0xb0] sm:$0xff] %v3174_v9  ;;  %v3176_v13 = vadd.f32 %v3175_v11, %v5679_v60  ;;  %v3139_v14 = vpop.f32.mrf.mxu0 }
 0x598   : > { %v3179_v15 = vpop.f32.mrf.mxu1  ;;  %3205 = vst [vmem:[%s5585_s5 + $0x38] sm:$0xff] %v3136_v12  ;;  %v3140_v16 = vadd.f32 %v3139_v14, %v5676_v58 }
 0x599   : > { %3221 = vst [vmem:[%s5585_s5 + $0xb8] sm:$0xff] %v3176_v13  ;;  %v3180_v17 = vadd.f32 %v3179_v15, %v5676_v58  ;;  %v3141_v18 = vpop.f32.mrf.mxu0 }
 0x59a   : > { %v3181_v19 = vpop.f32.mrf.mxu1  ;;  %3206 = vst [vmem:[%s5585_s5 + $0x40] sm:$0xff] %v3140_v16  ;;  %v3142_v20 = vadd.f32 %v3141_v18, %v5679_v60 }
 0x59b   : > { %3222 = vst [vmem:[%s5585_s5 + $0xc0] sm:$0xff] %v3180_v17  ;;  %v3182_v21 = vadd.f32 %v3181_v19, %v5679_v60  ;;  %v3143_v22 = vpop.f32.mrf.mxu0 }
 0x59c   : > { %v3183_v23 = vpop.f32.mrf.mxu1  ;;  %3207 = vst [vmem:[%s5585_s5 + $0x48] sm:$0xff] %v3142_v20  ;;  %v3144_v24 = vadd.f32 %v3143_v22, %v5676_v58 }
 0x59d   : > { %3223 = vst [vmem:[%s5585_s5 + $0xc8] sm:$0xff] %v3182_v21  ;;  %v3184_v25 = vadd.f32 %v3183_v23, %v5676_v58  ;;  %v3145_v26 = vpop.f32.mrf.mxu0 }
 0x59e   : > { %v3185_v28 = vpop.f32.mrf.mxu1  ;;  %3208 = vst [vmem:[%s5585_s5 + $0x50] sm:$0xff] %v3144_v24  ;;  %v3146_v27 = vadd.f32 %v3145_v26, %v5679_v60 }
 0x59f   : > { %3224 = vst [vmem:[%s5585_s5 + $0xd0] sm:$0xff] %v3184_v25  ;;  %v3186_v29 = vadd.f32 %v3185_v28, %v5679_v60  ;;  %v3149_v31 = vpop.f32.mrf.mxu0 }
 0x5a0   : > { %v3189_v32 = vpop.f32.mrf.mxu1  ;;  %3209 = vst [vmem:[%s5585_s5 + $0x58] sm:$0xff] %v3146_v27  ;;  %v3150_v34 = vadd.f32 %v3149_v31, %v5676_v58 }
 0x5a1   : > { %3225 = vst [vmem:[%s5585_s5 + $0xd8] sm:$0xff] %v3186_v29  ;;  %v3190_v36 = vadd.f32 %v3189_v32, %v5676_v58  ;;  %v3151_v37 = vpop.f32.mrf.mxu0 }
 0x5a2   : > { %v3191_v30 = vpop.f32.mrf.mxu1  ;;  %3210 = vst [vmem:[%s5585_s5 + $0x60] sm:$0xff] %v3150_v34  ;;  %v3152_v35 = vadd.f32 %v3151_v37, %v5679_v60 }
 0x5a3   : > { %3226 = vst [vmem:[%s5585_s5 + $0xe0] sm:$0xff] %v3190_v36  ;;  %v3192_v56 = vadd.f32 %v3191_v30, %v5679_v60  ;;  %v3153_v57 = vpop.f32.mrf.mxu0 }
 0x5a4   : > { %v3193_v38 = vpop.f32.mrf.mxu1  ;;  %3211 = vst [vmem:[%s5585_s5 + $0x68] sm:$0xff] %v3152_v35  ;;  %v3154_v33 = vadd.f32 %v3153_v57, %v5676_v58 }
 0x5a5   : > { %3227 = vst [vmem:[%s5585_s5 + $0xe8] sm:$0xff] %v3192_v56  ;;  %v3194_v41 = vadd.f32 %v3193_v38, %v5676_v58  ;;  %v3155_v42 = vpop.f32.mrf.mxu0 }
 0x5a6   : > { %v3195_v43 = vpop.f32.mrf.mxu1  ;;  %3212 = vst [vmem:[%s5585_s5 + $0x70] sm:$0xff] %v3154_v33  ;;  %v3156_v44 = vadd.f32 %v3155_v42, %v5679_v60 }
 0x5a7   : > { %3228 = vst [vmem:[%s5585_s5 + $0xf0] sm:$0xff] %v3194_v41  ;;  %v3196_v45 = vadd.f32 %v3195_v43, %v5679_v60 }
 0x5a8   : > { %3213 = vst [vmem:[%s5585_s5 + $0x78] sm:$0xff] %v3156_v44 }
 0x5a9   : > { %3229 = vst [vmem:[%s5585_s5 + $0xf8] sm:$0xff] %v3196_v45 }
 0x5aa   : > { %4943 = shalt.err (!%p4940_p13)
}
 0x5ab   : > { %s4944_s5 = scalar_lea.hbm %s5744_s3, 4096  ;;  %s4948_s12 = scalar_lea.hbm %s5866_s13, 8192 }
 0x5ac   : > { %p4945_p7 = scmp.ne.s32.totalorder %s5744_s3, %s4944_s5  ;;  %p4949_p0 = scmp.lt.s32.totalorder %s5744_s3, %s5866_s13 }
 0x5ad   : > { %p4950_p1 = scmp.lt.s32.totalorder %s4948_s12, %s4944_s5 }
 0x5ae   : > { %p4946_p9 = pnand %p4945_p7, %p5867_p11 }
 0x5af   : > { %p4951_p4 = por %p4950_p1, %p4949_p0 }
 0x5b0   : > { %p4947_p2 = pneg %p4946_p9 }
 0x5b2   : > { %p4952_p8 = pnand %p4951_p4, %p4947_p2 }
 0x5b4   : > { %4955 = shalt.err (!%p4952_p8)
}
 0x5b5   : > { %s5028_s11 = smov 256   ;;  %s5029_s15 = smov 16  }
 0x5b6   : > { %4357 = dma.vmem_to_hbm [thread:$0]  (%p5867_p11), %s5746_s25, 4096, %s5744_s3, %s3231_s21, %s5028_s11, %s5028_s11, %s5029_s15  }
 0x5b7 PF: > { %s5868_s24 = sld [smem:[#allocation24_spill]] }
 0x5b8   : > { %s5869_s22 = sld [smem:[#allocation26_spill]] }
 0x5b9   : > { %s5870_s23 = sld [smem:[#allocation25_spill]] }
 0x5bd   : > { %s3259_s28 = sand.u32 1, %s5868_s24  }
 0x5be   : > { %p5871_p12 = scmp.ne.s32.totalorder %s5869_s22, 0  ;;  %s3260_s26 = scalar_lea.sflag [#allocation8], %s3259_s28 }
 0x5bf   : > { %p5872_p10 = scmp.ge.s32.totalorder %s5870_s23, 2 }
 0x5c1   : > { %p4383_p5 = pnand %p5872_p10, %p5871_p12 }
 0x5c3   : > { %p4384_p3 = pneg %p4383_p5 }
 0x5c5   : > { %4993 = dma.done.wait (%p4384_p3), %s3260_s26, 4096  }
 0x5c6   : > { %4995 = vsyncadd (%p4384_p3), %s3260_s26, 4294963200  ;;  %s5873_s20 = sld [smem:[#allocation27_spill]]  ;;  %s5875_s17 = smov %s5002_s18 }
 0x5c7   : > { %s5874_s14 = sld [smem:[#allocation29_spill]]  ;;  %s5876_s18 = smov %s5006_s19 }
 0x5cc   : > { %p29_p6 = scmp.ge.s32.totalorder %s5873_s20, 4  }
 0x5cd   : > { %s5877_s19 = smov %s5874_s14 }
 0x5ce   :  { %31 = sbr.rel (!%p29_p6) target bundleno = 14 (0xe), region = 175 }
 0x5d3   :  { %3265 = vsyncpa [#allocation7], 1 }
 0x5d4   :  { %3267 = vsyncpa [#allocation7 + $0x1], 1 }
 0x5d5   :  { %3268 = vsyncpa [#allocation10], 1 }
 0x5d6   :  { %3270 = vsyncpa [#allocation10 + $0x1], 1 }
 0x5d7   :  { %3271 = vsyncpa [#allocation13], 1 }
 0x5d8   :  { %3272 = vsyncpa [#allocation16], 1 }
 0x5d9   :  { %3273 = vsyncpa [#allocation8], 1 }
 0x5da   :  { %3275 = vsyncpa [#allocation8 + $0x1], 1 }

</bundles_post_ra>
